<compile_context>
chip_gen: v7x
topology: tpu7x:2x2x1
jax: 0.10.0
libtpu: 0.0.40
codegen_flags: <defaults>
</compile_context>

<pallas_src>
import jax
import jax.numpy as jnp
from jax.experimental import pallas as pl
from jax.experimental.pallas import tpu as pltpu

IN_DIM = 768
HIDDEN = 256
LATENT = 32
MLV_PAD = 128  # fused (mu | logvar | zero-pad) head width, lane-dense

_BLOCK_B_CAP = 1024               # fits v7x 64 MiB VMEM; v5e/v6e could use 2048
_VMEM_LIMIT = 40 * 1024 * 1024


def _round_up(n, m):
    return ((n + m - 1) // m) * m


def _choose_block_b(B):
    """Batch tile: multiple of 16 (bf16 sublane packing), >=2 grid steps when
    B > 16 (so the 'parallel' axis can shard across v7x's two TensorCores),
    capped so the per-step working set stays inside v7x's 64 MiB VMEM."""
    if B <= 16:
        return B                  # block == full batch dim is always legal
    return min(_BLOCK_B_CAP, _round_up(pl.cdiv(B, 2), 16))


def _vae_kernel(x_ref, eps_ref,
                w1_ref, b1_ref,
                wml_ref, bml_ref,
                wd1_ref, bd1_ref,
                wd2_ref, bd2_ref,
                recon_ref, mulv_ref):
    cdt = w1_ref.dtype                       # compute dtype of MXU operands
    x = x_ref[...].astype(cdt)               # x arrives f32; cast in VMEM

    # ---- encoder ----
    h = jnp.dot(x, w1_ref[...], preferred_element_type=jnp.float32) + b1_ref[...]
    h = jnp.maximum(h, 0.0).astype(cdt)      # ReLU in f32, (TB, HIDDEN)

    # Fused mu/logvar head: cols [0:L)=mu, [L:2L)=logvar, rest zero-pad.
    mulv = jnp.dot(h, wml_ref[...], preferred_element_type=jnp.float32) + bml_ref[...]
    mu = mulv[:, :LATENT]                    # (TB, LATENT) f32
    logvar = mulv[:, LATENT:2 * LATENT]      # (TB, LATENT) f32

    # ---- reparameterize: z = mu + eps * exp(0.5 * logvar) (f32 EUP/VPU) ----
    std = jnp.exp(0.5 * logvar)
    z = (mu + eps_ref[...] * std).astype(cdt)

    # ---- decoder ----
    hd = jnp.dot(z, wd1_ref[...], preferred_element_type=jnp.float32) + bd1_ref[...]
    hd = jnp.maximum(hd, 0.0).astype(cdt)    # (TB, HIDDEN)
    recon = jnp.dot(hd, wd2_ref[...], preferred_element_type=jnp.float32) + bd2_ref[...]

    recon_ref[...] = recon.astype(recon_ref.dtype)
    mulv_ref[...] = mulv.astype(mulv_ref.dtype)


def prepare_params(params, compute_dtype=jnp.bfloat16):
    """One-time parameter prep, hoisted out of the per-forward path:
    fuse mu/logvar into a single lane-dense (HIDDEN, 128) head and cast the
    MXU weight operands to the compute dtype.  Biases stay f32."""
    (w1, b1, wmu, bmu, wlv, blv, wd1, bd1, wd2, bd2) = params
    wml = jnp.concatenate([wmu, wlv], axis=1)                    # (HIDDEN, 2L)
    wml = jnp.pad(wml, ((0, 0), (0, MLV_PAD - 2 * LATENT)))      # (HIDDEN, 128)
    bml = jnp.concatenate([bmu, blv], axis=1)                    # (1, 2L)
    bml = jnp.pad(bml, ((0, 0), (0, MLV_PAD - 2 * LATENT)))      # (1, 128)
    cdt = jnp.dtype(compute_dtype)
    return (w1.astype(cdt), b1.astype(jnp.float32),
            wml.astype(cdt), bml.astype(jnp.float32),
            wd1.astype(cdt), bd1.astype(jnp.float32),
            wd2.astype(cdt), bd2.astype(jnp.float32))


def vae_forward(x, eps, prepared, *, block_b=None):
    """Pallas VAE forward.

    x: (B, 768) f32; eps: (B, LATENT) f32 (the N(0,1) noise of reparameterize);
    prepared: output of prepare_params().
    Returns (recon (B,768) f32, mu (B,LATENT) f32, logvar (B,LATENT) f32).
    """
    B = x.shape[0]
    assert x.shape == (B, IN_DIM)
    assert eps.shape == (B, LATENT)
    (w1, b1, wml, bml, wd1, bd1, wd2, bd2) = prepared

    if block_b is None:
        block_b = _choose_block_b(B)
    # Ragged last block: OOB input rows read unspecified values (rows are
    # independent, so this is harmless) and OOB output rows are discarded,
    # so no wrapper-side padding pass over x is needed.
    grid = (pl.cdiv(B, block_b),)

    def batch_map(i):
        return (i, 0)

    def full_map(i):
        return (0, 0)

    in_specs = [
        pl.BlockSpec((block_b, IN_DIM), batch_map),    # x (f32; cast in-kernel)
        pl.BlockSpec((block_b, LATENT), batch_map),    # eps
        pl.BlockSpec((IN_DIM, HIDDEN), full_map),      # w1   (constant block -> no re-DMA)
        pl.BlockSpec((1, HIDDEN), full_map),           # b1
        pl.BlockSpec((HIDDEN, MLV_PAD), full_map),     # wml  (fused mu|logvar)
        pl.BlockSpec((1, MLV_PAD), full_map),          # bml
        pl.BlockSpec((LATENT, HIDDEN), full_map),      # wd1
        pl.BlockSpec((1, HIDDEN), full_map),           # bd1
        pl.BlockSpec((HIDDEN, IN_DIM), full_map),      # wd2
        pl.BlockSpec((1, IN_DIM), full_map),           # bd2
    ]
    out_specs = (
        pl.BlockSpec((block_b, IN_DIM), batch_map),    # recon
        pl.BlockSpec((block_b, MLV_PAD), batch_map),   # fused mu|logvar (lane-dense)
    )
    out_shape = (
        jax.ShapeDtypeStruct((B, IN_DIM), jnp.float32),
        jax.ShapeDtypeStruct((B, MLV_PAD), jnp.float32),
    )

    rows = grid[0] * block_b
    flops = 2 * rows * (IN_DIM * HIDDEN + HIDDEN * MLV_PAD
                        + LATENT * HIDDEN + HIDDEN * IN_DIM)
    bytes_accessed = int(
        B * IN_DIM * 4 + B * LATENT * 4            # x, eps in (f32)
        + B * IN_DIM * 4 + B * MLV_PAD * 4         # recon, mu|logvar out (f32)
        + sum(int(a.size) * a.dtype.itemsize for a in prepared))

    recon, mulv = pl.pallas_call(
        _vae_kernel,
        out_shape=out_shape,
        grid_spec=pltpu.PrefetchScalarGridSpec(
            num_scalar_prefetch=0,
            grid=grid,
            in_specs=in_specs,
            out_specs=out_specs,
        ),
        compiler_params=pltpu.CompilerParams(
            dimension_semantics=("parallel",),
            vmem_limit_bytes=_VMEM_LIMIT,
        ),
        cost_estimate=pl.CostEstimate(
            flops=flops,
            transcendentals=rows * LATENT,
            bytes_accessed=bytes_accessed,
        ),
    )(x, eps, w1, b1, wml, bml, wd1, bd1, wd2, bd2)

    return recon, mulv[:, :LATENT], mulv[:, LATENT:2 * LATENT]


def init_params(key):
    """Deterministic parameter init (matches the nn.Linear shapes of the module)."""
    ks = jax.random.split(key, 5)

    def linear(k, fan_in, fan_out):
        bound = 1.0 / jnp.sqrt(fan_in)
        kw, kb = jax.random.split(k)
        w = jax.random.uniform(kw, (fan_in, fan_out), jnp.float32, -bound, bound)
        b = jax.random.uniform(kb, (1, fan_out), jnp.float32, -bound, bound)
        return w, b

    w1, b1 = linear(ks[0], IN_DIM, HIDDEN)       # encoder_fc1
    wmu, bmu = linear(ks[1], HIDDEN, LATENT)     # encoder_fc2_mu
    wlv, blv = linear(ks[2], HIDDEN, LATENT)     # encoder_fc2_logvar
    wd1, bd1 = linear(ks[3], LATENT, HIDDEN)     # decoder_fc1
    wd2, bd2 = linear(ks[4], HIDDEN, IN_DIM)     # decoder_fc2
    return (w1, b1, wmu, bmu, wlv, blv, wd1, bd1, wd2, bd2)


def vae_forward_ref(x, eps, params):
    """Pure-JAX f32 reference of the PyTorch forward (highest matmul precision)."""
    (w1, b1, wmu, bmu, wlv, blv, wd1, bd1, wd2, bd2) = params
    hp = jax.lax.Precision.HIGHEST
    h = jax.nn.relu(jnp.dot(x, w1, precision=hp) + b1)
    mu = jnp.dot(h, wmu, precision=hp) + bmu
    logvar = jnp.dot(h, wlv, precision=hp) + blv
    z = mu + eps * jnp.exp(0.5 * logvar)
    hd = jax.nn.relu(jnp.dot(z, wd1, precision=hp) + bd1)
    recon = jnp.dot(hd, wd2, precision=hp) + bd2
    return recon, mu, logvar


if __name__ == "__main__":
    key = jax.random.PRNGKey(0)
    k_param, k_x, k_eps, k_x2, k_eps2 = jax.random.split(key, 5)

    params = init_params(k_param)

    # ---- small primary check: B=64 -> block_b=32, grid=(2,) ----
    # eps ~ N(0,1), matching torch.randn_like(std) (noise generated outside
    # the kernel for deterministic, framework-agnostic comparison).
    B = 64
    x = jax.random.normal(k_x, (B, IN_DIM), jnp.float32)
    eps = jax.random.normal(k_eps, (B, LATENT), jnp.float32)
    recon_r, mu_r, logvar_r = vae_forward_ref(x, eps, params)

    # exact-semantics path: f32 MXU operands
    prepped_f32 = prepare_params(params, jnp.float32)
    recon, mu, logvar = jax.block_until_ready(vae_forward(x, eps, prepped_f32))
    assert recon.shape == (B, IN_DIM)
    assert mu.shape == (B, LATENT) and logvar.shape == (B, LATENT)
    assert jnp.allclose(recon, recon_r, atol=2e-3, rtol=2e-3)
    assert jnp.allclose(mu, mu_r, atol=2e-3, rtol=2e-3)
    assert jnp.allclose(logvar, logvar_r, atol=2e-3, rtol=2e-3)

    # ---- fast path: bf16 MXU operands + ragged batch (exercises the
    #      boundary-block handling that replaces wrapper-side padding) ----
    B2 = 200                       # -> block_b=112, grid=(2,), last block ragged
    x2 = jax.random.normal(k_x2, (B2, IN_DIM), jnp.float32)
    eps2 = jax.random.normal(k_eps2, (B2, LATENT), jnp.float32)
    recon2_r, mu2_r, logvar2_r = vae_forward_ref(x2, eps2, params)

    prepped_bf16 = prepare_params(params, jnp.bfloat16)
    recon2, mu2, logvar2 = jax.block_until_ready(vae_forward(x2, eps2, prepped_bf16))
    assert recon2.shape == (B2, IN_DIM)
    assert jnp.allclose(recon2, recon2_r, atol=5e-2, rtol=5e-2)
    assert jnp.allclose(mu2, mu2_r, atol=5e-2, rtol=5e-2)
    assert jnp.allclose(logvar2, logvar2_r, atol=5e-2, rtol=5e-2)

    print("KERNEL_OK")
</pallas_src>

<mosaic_0001>
module attributes {stable_mosaic.version = 11 : i64} {
  func.func @_vae_kernel(%arg0: i32, %arg1: memref<32x768xf32, #tpu.memory_space<vmem>>, %arg2: memref<32x32xf32, #tpu.memory_space<vmem>>, %arg3: memref<768x256xf32, #tpu.memory_space<vmem>>, %arg4: memref<1x256xf32, #tpu.memory_space<vmem>>, %arg5: memref<256x128xf32, #tpu.memory_space<vmem>>, %arg6: memref<1x128xf32, #tpu.memory_space<vmem>>, %arg7: memref<32x256xf32, #tpu.memory_space<vmem>>, %arg8: memref<1x256xf32, #tpu.memory_space<vmem>>, %arg9: memref<256x768xf32, #tpu.memory_space<vmem>>, %arg10: memref<1x768xf32, #tpu.memory_space<vmem>>, %arg11: memref<32x768xf32, #tpu.memory_space<vmem>>, %arg12: memref<32x128xf32, #tpu.memory_space<vmem>>) attributes {dimension_semantics = [#tpu.dimension_semantics<parallel>], iteration_bounds = array<i64: 2>, scalar_prefetch = 0 : i64, scratch_operands = 0 : i64, tpu.core_type = #tpu.core_type<tc>, window_params = [{transform_indices = @transform_0, window_bounds = array<i64: 32, 768>}, {transform_indices = @transform_1, window_bounds = array<i64: 32, 32>}, {pipeline_mode = #tpu.pipeline_mode<synchronous>, transform_indices = @transform_2, window_bounds = array<i64: 768, 256>}, {pipeline_mode = #tpu.pipeline_mode<synchronous>, transform_indices = @transform_3, window_bounds = array<i64: 1, 256>}, {pipeline_mode = #tpu.pipeline_mode<synchronous>, transform_indices = @transform_4, window_bounds = array<i64: 256, 128>}, {pipeline_mode = #tpu.pipeline_mode<synchronous>, transform_indices = @transform_5, window_bounds = array<i64: 1, 128>}, {pipeline_mode = #tpu.pipeline_mode<synchronous>, transform_indices = @transform_6, window_bounds = array<i64: 32, 256>}, {pipeline_mode = #tpu.pipeline_mode<synchronous>, transform_indices = @transform_7, window_bounds = array<i64: 1, 256>}, {pipeline_mode = #tpu.pipeline_mode<synchronous>, transform_indices = @transform_8, window_bounds = array<i64: 256, 768>}, {pipeline_mode = #tpu.pipeline_mode<synchronous>, transform_indices = @transform_9, window_bounds = array<i64: 1, 768>}, {transform_indices = @transform_10, window_bounds = array<i64: 32, 768>}, {transform_indices = @transform_11, window_bounds = array<i64: 32, 128>}]} {
    %c0 = arith.constant 0 : index
    %c0_0 = arith.constant 0 : index
    %0 = vector.load %arg1[%c0, %c0_0] : memref<32x768xf32, #tpu.memory_space<vmem>>, vector<32x768xf32>
    %c0_1 = arith.constant 0 : index
    %c0_2 = arith.constant 0 : index
    %1 = vector.load %arg3[%c0_1, %c0_2] : memref<768x256xf32, #tpu.memory_space<vmem>>, vector<768x256xf32>
    %cst = arith.constant dense<0.000000e+00> : vector<32x256xf32>
    %2 = tpu.matmul %0, %1, %cst {dimension_numbers = #tpu.dot_dimension_numbers<[1], [0], [0], [1], [0, 0, 1, 1], [], []>} : vector<32x768xf32>, vector<768x256xf32>, vector<32x256xf32> -> vector<32x256xf32>
    %c0_3 = arith.constant 0 : index
    %c0_4 = arith.constant 0 : index
    %3 = vector.load %arg4[%c0_3, %c0_4] : memref<1x256xf32, #tpu.memory_space<vmem>>, vector<1x256xf32>
    %4 = vector.broadcast %3 : vector<1x256xf32> to vector<32x256xf32>
    %5 = arith.addf %2, %4 : vector<32x256xf32>
    %cst_5 = arith.constant 0.000000e+00 : f32
    %6 = vector.broadcast %cst_5 : f32 to vector<32x256xf32>
    %7 = arith.maximumf %5, %6 : vector<32x256xf32>
    %c0_6 = arith.constant 0 : index
    %c0_7 = arith.constant 0 : index
    %8 = vector.load %arg5[%c0_6, %c0_7] : memref<256x128xf32, #tpu.memory_space<vmem>>, vector<256x128xf32>
    %cst_8 = arith.constant dense<0.000000e+00> : vector<32x128xf32>
    %9 = tpu.matmul %7, %8, %cst_8 {dimension_numbers = #tpu.dot_dimension_numbers<[1], [0], [0], [1], [0, 0, 1, 1], [], []>} : vector<32x256xf32>, vector<256x128xf32>, vector<32x128xf32> -> vector<32x128xf32>
    %c0_9 = arith.constant 0 : index
    %c0_10 = arith.constant 0 : index
    %10 = vector.load %arg6[%c0_9, %c0_10] : memref<1x128xf32, #tpu.memory_space<vmem>>, vector<1x128xf32>
    %11 = vector.broadcast %10 : vector<1x128xf32> to vector<32x128xf32>
    %12 = arith.addf %9, %11 : vector<32x128xf32>
    %13 = vector.extract_strided_slice %12 {offsets = [0, 0], sizes = [32, 32], strides = [1, 1]} : vector<32x128xf32> to vector<32x32xf32>
    %14 = vector.extract_strided_slice %12 {offsets = [0, 32], sizes = [32, 32], strides = [1, 1]} : vector<32x128xf32> to vector<32x32xf32>
    %cst_11 = arith.constant 5.000000e-01 : f32
    %15 = vector.broadcast %cst_11 : f32 to vector<32x32xf32>
    %16 = arith.mulf %15, %14 : vector<32x32xf32>
    %17 = math.exp %16 : vector<32x32xf32>
    %c0_12 = arith.constant 0 : index
    %c0_13 = arith.constant 0 : index
    %18 = vector.load %arg2[%c0_12, %c0_13] : memref<32x32xf32, #tpu.memory_space<vmem>>, vector<32x32xf32>
    %19 = arith.mulf %18, %17 : vector<32x32xf32>
    %20 = arith.addf %13, %19 : vector<32x32xf32>
    %c0_14 = arith.constant 0 : index
    %c0_15 = arith.constant 0 : index
    %21 = vector.load %arg7[%c0_14, %c0_15] : memref<32x256xf32, #tpu.memory_space<vmem>>, vector<32x256xf32>
    %cst_16 = arith.constant dense<0.000000e+00> : vector<32x256xf32>
    %22 = tpu.matmul %20, %21, %cst_16 {dimension_numbers = #tpu.dot_dimension_numbers<[1], [0], [0], [1], [0, 0, 1, 1], [], []>} : vector<32x32xf32>, vector<32x256xf32>, vector<32x256xf32> -> vector<32x256xf32>
    %c0_17 = arith.constant 0 : index
    %c0_18 = arith.constant 0 : index
    %23 = vector.load %arg8[%c0_17, %c0_18] : memref<1x256xf32, #tpu.memory_space<vmem>>, vector<1x256xf32>
    %24 = vector.broadcast %23 : vector<1x256xf32> to vector<32x256xf32>
    %25 = arith.addf %22, %24 : vector<32x256xf32>
    %cst_19 = arith.constant 0.000000e+00 : f32
    %26 = vector.broadcast %cst_19 : f32 to vector<32x256xf32>
    %27 = arith.maximumf %25, %26 : vector<32x256xf32>
    %c0_20 = arith.constant 0 : index
    %c0_21 = arith.constant 0 : index
    %28 = vector.load %arg9[%c0_20, %c0_21] : memref<256x768xf32, #tpu.memory_space<vmem>>, vector<256x768xf32>
    %cst_22 = arith.constant dense<0.000000e+00> : vector<32x768xf32>
    %29 = tpu.matmul %27, %28, %cst_22 {dimension_numbers = #tpu.dot_dimension_numbers<[1], [0], [0], [1], [0, 0, 1, 1], [], []>} : vector<32x256xf32>, vector<256x768xf32>, vector<32x768xf32> -> vector<32x768xf32>
    %c0_23 = arith.constant 0 : index
    %c0_24 = arith.constant 0 : index
    %30 = vector.load %arg10[%c0_23, %c0_24] : memref<1x768xf32, #tpu.memory_space<vmem>>, vector<1x768xf32>
    %31 = vector.broadcast %30 : vector<1x768xf32> to vector<32x768xf32>
    %32 = arith.addf %29, %31 : vector<32x768xf32>
    %c0_25 = arith.constant 0 : index
    %c0_26 = arith.constant 0 : index
    %33 = vector.load %arg11[%c0_25, %c0_26] : memref<32x768xf32, #tpu.memory_space<vmem>>, vector<32x768xf32>
    tpu.vector_store %arg11[%c0_25, %c0_26], %32 {strides = array<i32>} : memref<32x768xf32, #tpu.memory_space<vmem>>, vector<32x768xf32>,
    %c0_27 = arith.constant 0 : index
    %c0_28 = arith.constant 0 : index
    %34 = vector.load %arg12[%c0_27, %c0_28] : memref<32x128xf32, #tpu.memory_space<vmem>>, vector<32x128xf32>
    tpu.vector_store %arg12[%c0_27, %c0_28], %12 {strides = array<i32>} : memref<32x128xf32, #tpu.memory_space<vmem>>, vector<32x128xf32>,
    return
  }
  func.func @transform_0(%arg0: i32) -> (i32, i32) {
    %c0_i32 = arith.constant 0 : i32
    %c0_i32_0 = arith.constant 0 : i32
    return %arg0, %c0_i32 : i32, i32
  }
  func.func @transform_1(%arg0: i32) -> (i32, i32) {
    %c0_i32 = arith.constant 0 : i32
    %c0_i32_0 = arith.constant 0 : i32
    return %arg0, %c0_i32 : i32, i32
  }
  func.func @transform_2(%arg0: i32) -> (i32, i32) {
    %c0_i32 = arith.constant 0 : i32
    %c0_i32_0 = arith.constant 0 : i32
    %c0_i32_1 = arith.constant 0 : i32
    return %c0_i32, %c0_i32_0 : i32, i32
  }
  func.func @transform_3(%arg0: i32) -> (i32, i32) {
    %c0_i32 = arith.constant 0 : i32
    %c0_i32_0 = arith.constant 0 : i32
    %c0_i32_1 = arith.constant 0 : i32
    return %c0_i32, %c0_i32_0 : i32, i32
  }
  func.func @transform_4(%arg0: i32) -> (i32, i32) {
    %c0_i32 = arith.constant 0 : i32
    %c0_i32_0 = arith.constant 0 : i32
    %c0_i32_1 = arith.constant 0 : i32
    return %c0_i32, %c0_i32_0 : i32, i32
  }
  func.func @transform_5(%arg0: i32) -> (i32, i32) {
    %c0_i32 = arith.constant 0 : i32
    %c0_i32_0 = arith.constant 0 : i32
    %c0_i32_1 = arith.constant 0 : i32
    return %c0_i32, %c0_i32_0 : i32, i32
  }
  func.func @transform_6(%arg0: i32) -> (i32, i32) {
    %c0_i32 = arith.constant 0 : i32
    %c0_i32_0 = arith.constant 0 : i32
    %c0_i32_1 = arith.constant 0 : i32
    return %c0_i32, %c0_i32_0 : i32, i32
  }
  func.func @transform_7(%arg0: i32) -> (i32, i32) {
    %c0_i32 = arith.constant 0 : i32
    %c0_i32_0 = arith.constant 0 : i32
    %c0_i32_1 = arith.constant 0 : i32
    return %c0_i32, %c0_i32_0 : i32, i32
  }
  func.func @transform_8(%arg0: i32) -> (i32, i32) {
    %c0_i32 = arith.constant 0 : i32
    %c0_i32_0 = arith.constant 0 : i32
    %c0_i32_1 = arith.constant 0 : i32
    return %c0_i32, %c0_i32_0 : i32, i32
  }
  func.func @transform_9(%arg0: i32) -> (i32, i32) {
    %c0_i32 = arith.constant 0 : i32
    %c0_i32_0 = arith.constant 0 : i32
    %c0_i32_1 = arith.constant 0 : i32
    return %c0_i32, %c0_i32_0 : i32, i32
  }
  func.func @transform_10(%arg0: i32) -> (i32, i32) {
    %c0_i32 = arith.constant 0 : i32
    %c0_i32_0 = arith.constant 0 : i32
    return %arg0, %c0_i32 : i32, i32
  }
  func.func @transform_11(%arg0: i32) -> (i32, i32) {
    %c0_i32 = arith.constant 0 : i32
    %c0_i32_0 = arith.constant 0 : i32
    return %arg0, %c0_i32 : i32, i32
  }
}

</mosaic_0001>

<bundles_post_ra>
// kernel: tpu_custom_call.1
= control target key start
LH: loop header
LB: loop body
LE: loop exit
PB: predicated region body
PF: predicated region fallthrough
CT: control target
= control target key end

     0   :  { %s3411_s0 = inlined_call_operand.hbm [shape: f32[64,768], index: 0, kind: input, shape index: {}]   ;;  %s3412_s1 = inlined_call_operand.vmem [shape: f32[64,32], index: 1, kind: input, shape index: {}]   ;;  %s3413_s2 = inlined_call_operand.hbm [shape: f32[768,256], index: 2, kind: input, shape index: {}]   ;;  %s3414_s3 = inlined_call_operand.vmem [shape: f32[1,256], index: 3, kind: input, shape index: {}]   ;;  %s3415_s4 = inlined_call_operand.hbm [shape: f32[256,128], index: 4, kind: input, shape index: {}]   ;;  %s3416_s5 = inlined_call_operand.vmem [shape: f32[1,128], index: 5, kind: input, shape index: {}]   ;;  %s3417_s6 = inlined_call_operand.vmem [shape: f32[32,256], index: 6, kind: input, shape index: {}]   ;;  %s3418_s7 = inlined_call_operand.vmem [shape: f32[1,256], index: 7, kind: input, shape index: {}]   ;;  %s3419_s8 = inlined_call_operand.hbm [shape: f32[256,768], index: 8, kind: input, shape index: {}]   ;;  %s3420_s9 = inlined_call_operand.vmem [shape: f32[1,768], index: 9, kind: input, shape index: {}]   ;;  %s3421_s10 = inlined_call_operand.hbm [shape: f32[64,768], index: 10, kind: output, shape index: {0}]   ;;  %s3422_s11 = inlined_call_operand.hbm [shape: f32[64,128], index: 11, kind: output, shape index: {1}]  }
   0x1   :  { %3432 = sst [smem:[#allocation20_spill]] %s3413_s2 }
   0x2   :  { %3433 = sst [smem:[#allocation21_spill]] %s3421_s10 }
   0x3   :  { %3434 = sst [smem:[#allocation22_spill]] %s3422_s11 }
   0x4   :  { %17 = vsyncpa [#allocation3], 0 }
   0x5   :  { %19 = vsyncpa [#allocation3 + $0x1], 0 }
   0x6   :  { %20 = vsyncpa [#allocation6], 0 }
   0x7   :  { %21 = vsyncpa [#allocation9], 0 }
   0x8   :  { %22 = vsyncpa [#allocation4], 0 }
   0x9   :  { %24 = vsyncpa [#allocation4 + $0x1], 0 }
   0xa   :  { %25 = vsyncpa [#allocation12], 0 }
   0xb   :  { %27 = vsyncpa [#allocation12 + $0x1], 0  ;;  %s2912_s17 = smov 0   ;;  %s2914_s18 = smov 0  }
   0xc   :  { %s2916_s19 = smov 0   ;;  %s2918_s20 = smov 0  }
   0xd LB: > { %3435 = sst [smem:[#allocation18_spill]] %s2820_s17  ;;  %s2933_s21 = sadd.s32 4294967295, %s2832_s20   ;;  %s2832_s20 = sphi %s2918_s20, %s3464_s20   ;;  %s2828_s19 = sphi %s2916_s19, %s3463_s19   ;;  %s2824_s18 = sphi %s2914_s18, %s3462_s18   ;;  %s2820_s17 = sphi %s2912_s17, %s3461_s17  }
   0xe   : > { %s1984_s22 = sadd.s32 4294967294, %s2832_s20   ;;  %p53_p0 = scmp.ne.s32.totalorder %s2824_s18, %s2820_s17 }
   0xf   : > { %p3423_p1 = scmp.eq.s32.totalorder %s2933_s21, 0  ;;  %p277_p3 = scmp.eq.s32.totalorder %s1984_s22, 1 }
  0x10   : > { %p1985_p5 = scmp.ge.s32.totalorder %s2832_s20, 1  ;;  %p310_p7 = scmp.lt.s32.totalorder %s2832_s20, 3 }
  0x11   : > { %p2942_p4 = por %p3423_p1, %p53_p0  ;;  %p2947_p6 = por %p277_p3, %p53_p0 }
  0x12   : > { %p2952_p8 = pnand %p1985_p5, %p310_p7  ;;  %s2834_s26 = smov [#allocation5]  }
  0x13   : > { %s3436_s23 = scalar_select %p2942_p4, 1, 0 }
  0x14   : > { %s3437_s24 = scalar_select %p2947_p6, 1, 0 }
  0x15   : > { %s3439_s25 = scalar_select %p2952_p8, 1, 0 }
  0x16   : > { %3438 = sst [smem:[#allocation19_spill]] %s3437_s24  ;;  %s322_s27 = sshll.u32 %s2834_s26, 4  ;;  %s2956_s27 = int_to_ptr.vmem [resolvable:$true] %s322_s27 }
  0x17   : > { %p2528_p9 = pneg %p2952_p8  ;;  %s2835_s29 = smov [#allocation7]  }
  0x18   : > { %s338_s30 = sshll.u32 %s2835_s29, 4  ;;  %s3441_s2 = sld [smem:[#allocation20_spill]]  ;;  %s2967_s30 = int_to_ptr.vmem [resolvable:$true] %s338_s30 }
  0x19   : > { %p2963_p11 = pnand %p2528_p9, %p3423_p1 }
  0x1b   : > { %p2977_p13 = pneg %p2963_p11 }
  0x1e   : > { %s2612_s14 = scalar_lea.hbm %s3441_s2, 24576 }
  0x1f   : > { %p2613_p12 = scmp.ne.s32.totalorder %s3441_s2, %s2612_s14  ;;  %p2619_p5 = scmp.lt.u32.totalorder %s2612_s14, %s3441_s2 }
  0x21   : > { %p2615_p0 = pnand %p2977_p13, %p2613_p12 }
  0x23   : > { %p2616_p3 = pneg %p2615_p0 }
  0x25   : > { %p2621_p7 = pnand %p2619_p5, %p2616_p3 }
  0x27   : > { %2624 = shalt.err (!%p2621_p7)
}
  0x28   : > { %s2625_s12 = scalar_lea.vmem %s2956_s27, 24576  ;;  %p2633_p2 = scmp.lt.s32.totalorder %s2956_s27, %s2956_s27 }
  0x29   : > { %p2626_p9 = scmp.ne.s32.totalorder %s2956_s27, %s2625_s12  ;;  %p2634_p6 = scmp.lt.s32.totalorder %s2625_s12, %s2625_s12 }
  0x2b   : > { %p2628_p10 = pnand %p2626_p9, %p2977_p13  ;;  %p2635_p12 = por %p2634_p6, %p2633_p2 }
  0x2d   : > { %p2629_p1 = pneg %p2628_p10 }
  0x2f   : > { %p2636_p0 = pnand %p2635_p12, %p2629_p1 }
  0x31   : > { %2639 = shalt.err (!%p2636_p0)
}
  0x32   : > { %s2836_s13 = smov 256   ;;  %s2837_s14 = smov 16  }
  0x33   : > { %2531 = dma.hbm_to_vmem [thread:$0]  (!%p2963_p11), %s3441_s2, 24576, %s2956_s27, [#allocation6], %s2836_s13, %s2836_s13, %s2837_s14  }
  0x34   : > { %s2640_s24 = scalar_lea.hbm %s3415_s4, 4096 }
  0x35   : > { %p2641_p2 = scmp.ne.s32.totalorder %s3415_s4, %s2640_s24  ;;  %p2647_p10 = scmp.lt.u32.totalorder %s2640_s24, %s3415_s4 }
  0x37   : > { %p2643_p1 = pnand %p2641_p2, %p2977_p13 }
  0x39   : > { %p2644_p6 = pneg %p2643_p1 }
  0x3b   : > { %p2649_p3 = pnand %p2647_p10, %p2644_p6 }
  0x3d   : > { %2652 = shalt.err (!%p2649_p3)
}
  0x3e   : > { %s2653_s27 = scalar_lea.vmem %s2967_s30, 4096  ;;  %p2661_p12 = scmp.lt.s32.totalorder %s2967_s30, %s2967_s30 }
  0x3f   : > { %p2654_p5 = scmp.ne.s32.totalorder %s2967_s30, %s2653_s27  ;;  %p2662_p0 = scmp.lt.s32.totalorder %s2653_s27, %s2653_s27 }
  0x41   : > { %p2656_p7 = pnand %p2654_p5, %p2977_p13  ;;  %p2663_p2 = por %p2662_p0, %p2661_p12 }
  0x43   : > { %p2657_p9 = pneg %p2656_p7 }
  0x45   : > { %p2664_p1 = pnand %p2663_p2, %p2657_p9 }
  0x47   : > { %2667 = shalt.err (!%p2664_p1)
}
  0x48   : > { %s2838_s10 = smov 128   ;;  %s2839_s11 = smov 8  }
  0x49   : > { %2534 = dma.hbm_to_vmem [thread:$0]  (!%p2963_p11), %s3415_s4, 4096, %s2967_s30, [#allocation6], %s2838_s10, %s2838_s10, %s2839_s11  }
  0x4a   : > { %s2840_s13 = smov [#allocation8]   ;;  %s2668_s26 = scalar_lea.hbm %s3419_s8, 24576 }
  0x4b   : > { %s360_s14 = sshll.u32 %s2840_s13, 4  ;;  %p2669_p6 = scmp.ne.s32.totalorder %s3419_s8, %s2668_s26  ;;  %s361_s14 = int_to_ptr.vmem [resolvable:$true] %s360_s14 }
  0x4c   : > { %p2675_p5 = scmp.lt.u32.totalorder %s2668_s26, %s3419_s8 }
  0x4d   : > { %p2671_p10 = pnand %p2669_p6, %p2977_p13 }
  0x4f   : > { %p2672_p3 = pneg %p2671_p10 }
  0x51   : > { %p2677_p7 = pnand %p2675_p5, %p2672_p3 }
  0x53   : > { %2680 = shalt.err (!%p2677_p7)
}
  0x54   : > { %s2681_s30 = scalar_lea.vmem %s361_s14, 24576  ;;  %p2689_p2 = scmp.lt.s32.totalorder %s361_s14, %s361_s14 }
  0x55   : > { %p2682_p9 = scmp.ne.s32.totalorder %s361_s14, %s2681_s30  ;;  %p2690_p1 = scmp.lt.s32.totalorder %s2681_s30, %s2681_s30 }
  0x57   : > { %p2684_p12 = pnand %p2682_p9, %p2977_p13  ;;  %p2691_p4 = por %p2690_p1, %p2689_p2 }
  0x59   : > { %p2685_p0 = pneg %p2684_p12 }
  0x5b   : > { %p2692_p8 = pnand %p2691_p4, %p2685_p0 }
  0x5d   : > { %2695 = shalt.err (!%p2692_p8)
}
  0x5e   : > { %s3430_s10 = smov 768   ;;  %s3431_s2 = smov 48  }
  0x5f   : > { %2537 = dma.hbm_to_vmem [thread:$0]  (!%p2963_p11), %s3419_s8, 24576, %s361_s14, [#allocation9], %s3430_s10, %s3430_s10, %s3431_s2  }
  0x60   : > { %s3043_s17 = sadd.s32 1, %s2832_s20   ;;  %s40_s13 = sadd.s32 1, %s2828_s19 }
  0x61   : > { %s37_s24 = ssub.s32 %s2832_s20, %s3043_s17  ;;  %p47_p8 = scmp.ne.s32.totalorder %s2828_s19, %s2824_s18 }
  0x62   : > { %p38_p4 = scmp.eq.s32.totalorder %s37_s24, 0  ;;  %p48_p13 = scmp.eq.s32.totalorder %s2832_s20, 0 }
  0x63   : > { %p2552_p6 = scmp.lt.s32.totalorder %s2832_s20, 2  ;;  %p3443_p3 = scmp.eq.s32.totalorder %s2933_s21, 1 }
  0x64   : > { %s3053_s15 = scalar_select %p38_p4, %s2828_s19, %s40_s13  }
  0x65   : > { %p49_p10 = por %p48_p13, %p47_p8  ;;  %p3057_p5 = por %p3443_p3, %p47_p8 }
  0x66   : > { %s377_s16 = sand.u32 1, %s2828_s19   ;;  %s2507_s26 = smul.u32 3072, %s2832_s20 }
  0x67   : > { %s2506_s14 = smul.u32 192, %s377_s16  ;;  %p3063_p11 = pnand %p2552_p6, %p49_p10 }
  0x68   : > { %s3070_s30 = scalar_lea.hbm %s3411_s0, %s2507_s26  ;;  %s3074_s24 = scalar_lea.sflag [#allocation3], %s377_s16 }
  0x69   : > { %s381_s22 = scalar_lea.vmem [#allocation2], %s2506_s14  ;;  %s2696_s13 = scalar_lea.hbm %s3070_s30, 3072 }
  0x6a   : > { %s389_s11 = sshll.u32 %s381_s22, 4  ;;  %p2697_p7 = scmp.ne.s32.totalorder %s3070_s30, %s2696_s13  ;;  %s3072_s11 = int_to_ptr.vmem [resolvable:$true] %s389_s11 }
  0x6b   : > { %p2698_p9 = pneg %p3063_p11  ;;  %s2701_s27 = scalar_lea.hbm %s3411_s0, 6144 }
  0x6c   : > { %p2702_p2 = scmp.lt.u32.totalorder %s3070_s30, %s3411_s0  ;;  %p2703_p1 = scmp.lt.u32.totalorder %s2701_s27, %s2696_s13 }
  0x6d   : > { %p2699_p12 = pnand %p2698_p9, %p2697_p7  ;;  %p2705_p8 = scmp.lt.u32.totalorder %s2696_s13, %s3070_s30 }
  0x6e   : > { %p2704_p4 = por %p2703_p1, %p2702_p2 }
  0x6f   : > { %p2700_p0 = pneg %p2699_p12 }
  0x70   : > { %p2706_p13 = por %p2705_p8, %p2704_p4 }
  0x72   : > { %p2707_p6 = pnand %p2706_p13, %p2700_p0 }
  0x74   : > { %2710 = shalt.err (!%p2707_p6)
}
  0x75   : > { %s2711_s16 = scalar_lea.vmem %s3072_s11, 3072  ;;  %s2843_s14 = smov [#allocation2]  }
  0x76   : > { %p2712_p10 = scmp.ne.s32.totalorder %s3072_s11, %s2711_s16  ;;  %s2716_s22 = sshll.u32 %s2843_s14, 4  ;;  %s2717_s22 = int_to_ptr.vmem [resolvable:$false] %s2716_s22 }
  0x77   : > { %s2718_s10 = scalar_lea.vmem %s2717_s22, 6144  ;;  %p2719_p12 = scmp.lt.s32.totalorder %s3072_s11, %s2717_s22 }
  0x78   : > { %p2714_p3 = pnand %p2712_p10, %p2698_p9  ;;  %p2720_p2 = scmp.lt.s32.totalorder %s2718_s10, %s2711_s16 }
  0x7a   : > { %p2715_p7 = pneg %p2714_p3  ;;  %p2721_p1 = por %p2720_p2, %p2719_p12 }
  0x7c   : > { %p2722_p4 = pnand %p2721_p1, %p2715_p7 }
  0x7e   : > { %2725 = shalt.err (!%p2722_p4)
}
  0x7f   : > { %s3446_s2 = smov 48   ;;  %s3447_s13 = smov 768  }
  0x80   : > { %2541 = dma.hbm_to_vmem [thread:$0]  (!%p3063_p11), %s3070_s30, 3072, %s3072_s11, %s3074_s24, %s3447_s13, %s3447_s13, %s3446_s2  }
  0x81   : > { %p3448_p9 = scmp.ne.s32.totalorder %s3439_s25, 0 }
  0x82   : > { %s3108_s26 = sand.u32 (!%p3448_p9), 1, %s2824_s18   ;;  %p3449_p0 = scmp.ne.s32.totalorder (!%p3448_p9), %s3436_s23, 0 }
  0x83   : > { %410 = sbr.rel (%p3448_p9) target bundleno = 1498 (0x5da), region = 60  ;;  %s413_s27 = scalar_lea.sflag (!%p3448_p9), [#allocation3], %s3108_s26 }
  0x84   : > { %s2508_s12 = smul.u32 (!%p3448_p9), 192, %s3108_s26 }
  0x86   : > { %s3114_s29 = scalar_lea.vmem (!%p3448_p9), [#allocation2], %s2508_s12 }
  0x8a   : > { %2799 = dma.done.wait (%p3449_p0), %s413_s27, 3072  }
  0x8b   : > { %2801 = vsyncadd (%p3449_p0), %s413_s27, 4294964224  ;;  %p3450_p11 = scmp.eq.s32.totalorder %s2933_s21, 0 }
  0x8d   : > { %2803 = dma.done.wait (%p3450_p11), [#allocation6], 28672   ;;  %p3451_p8 = pmov %p3450_p11 }
  0x8f   : > { %2805 = vsyncadd (%p3451_p8), [#allocation6], 4294938624  ;;  %p3452_p13 = pmov %p3451_p8 }
  0x90   : > { %p3453_p6 = pmov %p3451_p8 }
  0x91   : > { %2807 = dma.done.wait (%p3452_p13), [#allocation9], 24576  }
  0x92   : > { %2809 = vsyncadd (%p3453_p6), [#allocation9], 4294942720  ;;  %v511_v0 = vld [vmem:[#allocation5 + $0x8] sm:$0xff]  ;;  %v513_v1 = vld [vmem:[#allocation5 + $0x18] sm:$0xff]  ;;  %s1997_s13 = sshll.u32 %s3108_s26, 5  ;;  %s2845_s2 = smov 96  }
  0x93   : > { %v510_v2 = vld [vmem:[#allocation5] sm:$0xff]  ;;  %v2058_v3 = vpack.c.bf16 %v513_v1, %v511_v0  ;;  %v512_v4 = vld [vmem:[#allocation5 + $0x10] sm:$0xff]  ;;  %v515_v5 = vld [vmem:[#allocation5 + $0x28] sm:$0xff]  ;;  %s3190_s24 = scalar_lea.vmem [#allocation11], %s1997_s13  ;;  %s1998_s13 = sshll.u32 %s2933_s21, 2  ;;  %vm1173_vm0 = vcmask 261120  }
  0x94   : > { %v517_v6 = vld [vmem:[#allocation5 + $0x38] sm:$0xff]  ;;  %v2060_v7 = vpack.c.bf16 %v512_v4, %v510_v2  ;;  %v514_v9 = vld [vmem:[#allocation5 + $0x20] sm:$0xff]  ;;  %v516_v10 = vld [vmem:[#allocation5 + $0x30] sm:$0xff]  ;;  %p479_p10 = scmp.lt.s32.totalorder %s1998_s13, 7  ;;  %s3293_s22 = scalar_lea.vmem [#allocation10], %s2508_s12 }
  0x95   : > { %v2062_v8 = vpack.c.bf16 %v517_v6, %v515_v5  ;;  %v519_v11 = vld [vmem:[#allocation5 + $0x48] sm:$0xff]  ;;  %2059 = vmatprep.subr.bf16.mxu0 %v2058_v3  ;;  %v521_v12 = vld [vmem:[#allocation5 + $0x58] sm:$0xff]  ;;  %v2064_v13 = vpack.c.bf16 %v516_v10, %v514_v9  ;;  %v518_v15 = vld [vmem:[#allocation5 + $0x40] sm:$0xff]  ;;  %s1838_s12 = sshll.u32 %s3190_s24, 4  ;;  %s2013_s10 = sshll.u32 %s2933_s21, 9  ;;  %s3305_s12 = int_to_ptr.vmem [resolvable:$true] %s1838_s12 }
  0x96   : > { %2061 = vmatpush1.bf16.msra.mxu0 %v2060_v7  ;;  %v2066_v14 = vpack.c.bf16 %v521_v12, %v519_v11  ;;  %v520_v16 = vld [vmem:[#allocation5 + $0x50] sm:$0xff]  ;;  %v523_v17 = vld [vmem:[#allocation5 + $0x68] sm:$0xff]  ;;  %v525_v18 = vld [vmem:[#allocation5 + $0x78] sm:$0xff]  ;;  %s3466_s13 = smov (!%p479_p10, %s1998_s13), 7  ;;  %s1808_s23 = scalar_lea.sflag [#allocation12], %s3108_s26 }
  0x97   : > { %2063 = vmatprep.subr.bf16.mxu0 %v2062_v8  ;;  %v2068_v19 = vpack.c.bf16 %v520_v16, %v518_v15  ;;  %v2070_v20 = vpack.c.bf16 %v525_v18, %v523_v17  ;;  %v522_v21 = vld [vmem:[#allocation5 + $0x60] sm:$0xff]  ;;  %v524_v22 = vld [vmem:[#allocation5 + $0x70] sm:$0xff]  ;;  %v527_v23 = vld [vmem:[#allocation5 + $0x88] sm:$0xff]  ;;  %s1999_s27 = sshll.u32 %s3466_s13, 3 }
  0x98   : > { %v529_v24 = vld [vmem:[#allocation5 + $0x98] sm:$0xff]  ;;  %v2072_v25 = vpack.c.bf16 %v524_v22, %v522_v21  ;;  %v526_v27 = vld [vmem:[#allocation5 + $0x80] sm:$0xff]  ;;  %v528_v28 = vld [vmem:[#allocation5 + $0x90] sm:$0xff]  ;;  %s3220_s25 = scalar_lea.vmem %s3412_s1, %s1999_s27  ;;  %s3454_s27 = sld [smem:[#allocation22_spill]] }
  0x99   : > { %v2074_v26 = vpack.c.bf16 %v529_v24, %v527_v23  ;;  %v531_v29 = vld [vmem:[#allocation5 + $0xa8] sm:$0xff]  ;;  %v533_v30 = vld [vmem:[#allocation5 + $0xb8] sm:$0xff]  ;;  %v2076_v31 = vpack.c.bf16 %v528_v28, %v526_v27  ;;  %v530_v33 = vld [vmem:[#allocation5 + $0xa0] sm:$0xff] }
  0x9a   : > { %2065 = vmatpush1.bf16.msra.mxu0 %v2064_v13  ;;  %v2078_v32 = vpack.c.bf16 %v533_v30, %v531_v29  ;;  %v532_v34 = vld [vmem:[#allocation5 + $0xb0] sm:$0xff]  ;;  %v535_v35 = vld [vmem:[#allocation5 + $0xc8] sm:$0xff]  ;;  %v537_v36 = vld [vmem:[#allocation5 + $0xd8] sm:$0xff] }
  0x9b   : > { %2067 = vmatprep.subr.bf16.mxu0 %v2066_v14  ;;  %v2080_v37 = vpack.c.bf16 %v532_v34, %v530_v33  ;;  %v2082_v38 = vpack.c.bf16 %v537_v36, %v535_v35  ;;  %v534_v39 = vld [vmem:[#allocation5 + $0xc0] sm:$0xff]  ;;  %v536_v40 = vld [vmem:[#allocation5 + $0xd0] sm:$0xff]  ;;  %v487_v41 = vld [vmem:[%s3114_s29 + $0x8] sm:$0xff] }
  0x9c   : > { %v539_v42 = vld [vmem:[#allocation5 + $0xe8] sm:$0xff]  ;;  %v541_v43 = vld [vmem:[#allocation5 + $0xf8] sm:$0xff]  ;;  %778 = vmatprep.mubr.f32.mxu0 %v487_v41  ;;  %v2084_v44 = vpack.c.bf16 %v536_v40, %v534_v39  ;;  %v538_v46 = vld [vmem:[#allocation5 + $0xe0] sm:$0xff] }
  0x9d   : > { %v2086_v45 = vpack.c.bf16 %v541_v43, %v539_v42  ;;  %v540_v47 = vld [vmem:[#allocation5 + $0xf0] sm:$0xff]  ;;  %v543_v48 = vld [vmem:[#allocation5 + $0x108] sm:$0xff]  ;;  %v545_v49 = vld [vmem:[#allocation5 + $0x118] sm:$0xff] }
  0x9e   : > { %2069 = vmatpush1.bf16.msra.mxu0 %v2068_v19  ;;  %v2088_v50 = vpack.c.bf16 %v540_v47, %v538_v46  ;;  %v2090_v51 = vpack.c.bf16 %v545_v49, %v543_v48  ;;  %v542_v52 = vld [vmem:[#allocation5 + $0x100] sm:$0xff]  ;;  %v544_v53 = vld [vmem:[#allocation5 + $0x110] sm:$0xff]  ;;  %v547_v54 = vld [vmem:[#allocation5 + $0x128] sm:$0xff] }
  0x9f   : > { %2071 = vmatprep.subr.bf16.mxu0 %v2070_v20  ;;  %v549_v55 = vld [vmem:[#allocation5 + $0x138] sm:$0xff]  ;;  %v2092_v56 = vpack.c.bf16 %v544_v53, %v542_v52  ;;  %v546_v58 = vld [vmem:[#allocation5 + $0x120] sm:$0xff]  ;;  %v548_v59 = vld [vmem:[#allocation5 + $0x130] sm:$0xff] }
  0xa0   : > { %v2094_v57 = vpack.c.bf16 %v549_v55, %v547_v54  ;;  %v551_v60 = vld [vmem:[#allocation5 + $0x148] sm:$0xff]  ;;  %v553_v61 = vld [vmem:[#allocation5 + $0x158] sm:$0xff]  ;;  %v2096_v62 = vpack.c.bf16 %v548_v59, %v546_v58  ;;  %v550_v0 = vld [vmem:[#allocation5 + $0x140] sm:$0xff] }
  0xa1   : > { %v2098_v63 = vpack.c.bf16 %v553_v61, %v551_v60  ;;  %v552_v1 = vld [vmem:[#allocation5 + $0x150] sm:$0xff]  ;;  %v555_v2 = vld [vmem:[#allocation5 + $0x168] sm:$0xff]  ;;  %v557_v3 = vld [vmem:[#allocation5 + $0x178] sm:$0xff] }
  0xa2   : > { %2073 = vmatpush1.bf16.msra.mxu0 %v2072_v25  ;;  %v2100_v4 = vpack.c.bf16 %v552_v1, %v550_v0  ;;  %v2102_v5 = vpack.c.bf16 %v557_v3, %v555_v2  ;;  %v554_v6 = vld [vmem:[#allocation5 + $0x160] sm:$0xff]  ;;  %v556_v7 = vld [vmem:[#allocation5 + $0x170] sm:$0xff]  ;;  %v559_v8 = vld [vmem:[#allocation5 + $0x188] sm:$0xff] }
  0xa3   : > { %2075 = vmatprep.subr.bf16.mxu0 %v2074_v26  ;;  %v561_v9 = vld [vmem:[#allocation5 + $0x198] sm:$0xff]  ;;  %v2104_v10 = vpack.c.bf16 %v556_v7, %v554_v6  ;;  %v558_v12 = vld [vmem:[#allocation5 + $0x180] sm:$0xff]  ;;  %v560_v13 = vld [vmem:[#allocation5 + $0x190] sm:$0xff] }
  0xa4   : > { %v2106_v11 = vpack.c.bf16 %v561_v9, %v559_v8  ;;  %v563_v14 = vld [vmem:[#allocation5 + $0x1a8] sm:$0xff]  ;;  %v565_v15 = vld [vmem:[#allocation5 + $0x1b8] sm:$0xff]  ;;  %v2108_v16 = vpack.c.bf16 %v560_v13, %v558_v12  ;;  %v562_v18 = vld [vmem:[#allocation5 + $0x1a0] sm:$0xff] }
  0xa5   : > { %v2110_v17 = vpack.c.bf16 %v565_v15, %v563_v14  ;;  %v564_v19 = vld [vmem:[#allocation5 + $0x1b0] sm:$0xff]  ;;  %v567_v20 = vld [vmem:[#allocation5 + $0x1c8] sm:$0xff]  ;;  %v569_v21 = vld [vmem:[#allocation5 + $0x1d8] sm:$0xff] }
  0xa6   : > { %2077 = vmatpush1.bf16.msra.mxu0 %v2076_v31  ;;  %v2112_v22 = vpack.c.bf16 %v564_v19, %v562_v18  ;;  %v2114_v23 = vpack.c.bf16 %v569_v21, %v567_v20  ;;  %v566_v24 = vld [vmem:[#allocation5 + $0x1c0] sm:$0xff]  ;;  %v568_v25 = vld [vmem:[#allocation5 + $0x1d0] sm:$0xff]  ;;  %v571_v26 = vld [vmem:[#allocation5 + $0x1e8] sm:$0xff] }
  0xa7   : > { %2079 = vmatprep.subr.bf16.mxu0 %v2078_v32  ;;  %v573_v27 = vld [vmem:[#allocation5 + $0x1f8] sm:$0xff]  ;;  %v2116_v28 = vpack.c.bf16 %v568_v25, %v566_v24  ;;  %v570_v30 = vld [vmem:[#allocation5 + $0x1e0] sm:$0xff]  ;;  %v572_v31 = vld [vmem:[#allocation5 + $0x1f0] sm:$0xff] }
  0xa8   : > { %v2118_v29 = vpack.c.bf16 %v573_v27, %v571_v26  ;;  %v575_v32 = vld [vmem:[#allocation5 + $0x208] sm:$0xff]  ;;  %v577_v33 = vld [vmem:[#allocation5 + $0x218] sm:$0xff]  ;;  %v2120_v34 = vpack.c.bf16 %v572_v31, %v570_v30  ;;  %v574_v36 = vld [vmem:[#allocation5 + $0x200] sm:$0xff] }
  0xa9   : > { %v2122_v35 = vpack.c.bf16 %v577_v33, %v575_v32  ;;  %v581_v39 = vld [vmem:[#allocation5 + $0x238] sm:$0xff]  ;;  %v486_v40 = vld [vmem:[%s3114_s29] sm:$0xff]  ;;  %v583_v46 = vld [vmem:[#allocation5 + $0x248] sm:$0xff] }
  0xaa   : > { %2081 = vmatpush1.bf16.msra.mxu0 %v2080_v37  ;;  %v576_v37 = vld [vmem:[#allocation5 + $0x210] sm:$0xff]  ;;  %v578_v43 = vld [vmem:[#allocation5 + $0x220] sm:$0xff]  ;;  %v585_v47 = vld [vmem:[#allocation5 + $0x258] sm:$0xff] }
  0xab   : > { %2083 = vmatprep.subr.bf16.mxu0 %v2082_v38  ;;  %v579_v38 = vld [vmem:[#allocation5 + $0x228] sm:$0xff]  ;;  %v2124_v41 = vpack.c.bf16 %v576_v37, %v574_v36  ;;  %v492_v49 = vld [vmem:[%s3114_s29 + $0x30] sm:$0xff]  ;;  %v589_v55 = vld [vmem:[#allocation5 + $0x278] sm:$0xff] }
  0xac   : > { %v2126_v42 = vpack.c.bf16 %v581_v39, %v579_v38  ;;  %v584_v52 = vld [vmem:[#allocation5 + $0x250] sm:$0xff]  ;;  %v499_v53 = vld [vmem:[%s3114_s29 + $0x68] sm:$0xff]  ;;  %v586_v59 = vld [vmem:[#allocation5 + $0x260] sm:$0xff] }
  0xad   : > { %v587_v54 = vld [vmem:[#allocation5 + $0x268] sm:$0xff]  ;;  %v588_v60 = vld [vmem:[#allocation5 + $0x270] sm:$0xff]  ;;  %v505_v61 = vld [vmem:[%s3114_s29 + $0x98] sm:$0xff] }
  0xae   : > { %2085 = vmatpush1.bf16.msra.mxu0 %v2084_v44  ;;  %v580_v44 = vld [vmem:[#allocation5 + $0x230] sm:$0xff]  ;;  %v2134_v58 = vpack.c.bf16 %v589_v55, %v587_v54  ;;  %v2136_v0 = vpack.c.bf16 %v588_v60, %v586_v59  ;;  %v590_v3 = vld [vmem:[#allocation5 + $0x280] sm:$0xff]  ;;  %v595_v6 = vld [vmem:[#allocation5 + $0x2a8] sm:$0xff] }
  0xaf   : > { %2087 = vmatprep.subr.bf16.mxu0 %v2086_v45  ;;  %v493_v45 = vld [vmem:[%s3114_s29 + $0x38] sm:$0xff]  ;;  %v2128_v48 = vpack.c.bf16 %v580_v44, %v578_v43  ;;  %v504_v1 = vld [vmem:[%s3114_s29 + $0x90] sm:$0xff]  ;;  %v599_v12 = vld [vmem:[#allocation5 + $0x2c8] sm:$0xff] }
  0xb0   : > { %v597_v7 = vld [vmem:[#allocation5 + $0x2b8] sm:$0xff]  ;;  %v603_v18 = vld [vmem:[#allocation5 + $0x2e8] sm:$0xff]  ;;  %v628_v59 = vld [vmem:[#allocation5 + $0x3b0] sm:$0xff] }
  0xb1   : > { %v2142_v9 = vpack.c.bf16 %v597_v7, %v595_v6  ;;  %v601_v13 = vld [vmem:[#allocation5 + $0x2d8] sm:$0xff]  ;;  %v607_v24 = vld [vmem:[#allocation5 + $0x308] sm:$0xff]  ;;  %v634_v6 = vld [vmem:[#allocation5 + $0x3e0] sm:$0xff] }
  0xb2   : > { %2089 = vmatpush1.bf16.msra.mxu0 %v2088_v50  ;;  %v2130_v50 = vpack.c.bf16 %v585_v47, %v583_v46  ;;  %v2146_v15 = vpack.c.bf16 %v601_v13, %v599_v12  ;;  %v605_v19 = vld [vmem:[#allocation5 + $0x2f8] sm:$0xff]  ;;  %v611_v30 = vld [vmem:[#allocation5 + $0x328] sm:$0xff]  ;;  %v618_v46 = vld [vmem:[#allocation5 + $0x360] sm:$0xff] }
  0xb3   : > { %2091 = vmatprep.subr.bf16.mxu0 %v2090_v51  ;;  %v582_v51 = vld [vmem:[#allocation5 + $0x240] sm:$0xff]  ;;  %v2150_v21 = vpack.c.bf16 %v605_v19, %v603_v18  ;;  %v609_v25 = vld [vmem:[#allocation5 + $0x318] sm:$0xff]  ;;  %v615_v36 = vld [vmem:[#allocation5 + $0x348] sm:$0xff] }
  0xb4   : > { %v2154_v27 = vpack.c.bf16 %v609_v25, %v607_v24  ;;  %v613_v31 = vld [vmem:[#allocation5 + $0x338] sm:$0xff]  ;;  %v620_v47 = vld [vmem:[#allocation5 + $0x370] sm:$0xff]  ;;  %v627_v54 = vld [vmem:[#allocation5 + $0x3a8] sm:$0xff] }
  0xb5   : > { %v2158_v33 = vpack.c.bf16 %v613_v31, %v611_v30  ;;  %v617_v37 = vld [vmem:[#allocation5 + $0x358] sm:$0xff]  ;;  %v631_v60 = vld [vmem:[#allocation5 + $0x3c8] sm:$0xff]  ;;  %v636_v7 = vld [vmem:[#allocation5 + $0x3f0] sm:$0xff] }
  0xb6   : > { %2093 = vmatpush1.bf16.msra.mxu0 %v2092_v56  ;;  %v2132_v56 = vpack.c.bf16 %v584_v52, %v582_v51  ;;  %v2162_v39 = vpack.c.bf16 %v617_v37, %v615_v36  ;;  %v621_v43 = vld [vmem:[#allocation5 + $0x378] sm:$0xff]  ;;  %v622_v52 = vld [vmem:[#allocation5 + $0x380] sm:$0xff]  ;;  %v640_v13 = vld [vmem:[#allocation5 + $0x410] sm:$0xff] }
  0xb7   : > { %2095 = vmatprep.subr.bf16.mxu0 %v2094_v57  ;;  %v498_v57 = vld [vmem:[%s3114_s29 + $0x60] sm:$0xff]  ;;  %v629_v55 = vld [vmem:[#allocation5 + $0x3b8] sm:$0xff]  ;;  %v651_v30 = vld [vmem:[#allocation5 + $0x468] sm:$0xff] }
  0xb8   : > { %v638_v12 = vld [vmem:[#allocation5 + $0x400] sm:$0xff]  ;;  %v653_v31 = vld [vmem:[#allocation5 + $0x478] sm:$0xff]  ;;  %v652_v36 = vld [vmem:[#allocation5 + $0x470] sm:$0xff] }
  0xb9   : > { %v642_v19 = vld [vmem:[#allocation5 + $0x420] sm:$0xff]  ;;  %v507_v37 = vld [vmem:[%s3114_s29 + $0xa8] sm:$0xff] }
  0xba   : > { %2097 = vmatpush1.bf16.msra.mxu0 %v2096_v62  ;;  %v591_v62 = vld [vmem:[#allocation5 + $0x288] sm:$0xff]  ;;  %v494_v25 = vld [vmem:[%s3114_s29 + $0x40] sm:$0xff] }
  0xbb   : > { %2099 = vmatprep.subr.bf16.mxu0 %v2098_v63  ;;  %v593_v63 = vld [vmem:[#allocation5 + $0x298] sm:$0xff] }
  0xbc   : > { %v2138_v2 = vpack.c.bf16 %v593_v63, %v591_v62 }
  0xbe   : > { %2101 = vmatpush1.bf16.msra.mxu0 %v2100_v4  ;;  %v592_v4 = vld [vmem:[#allocation5 + $0x290] sm:$0xff] }
  0xbf   : > { %2103 = vmatprep.subr.bf16.mxu0 %v2102_v5  ;;  %v489_v5 = vld [vmem:[%s3114_s29 + $0x18] sm:$0xff]  ;;  %v2140_v8 = vpack.c.bf16 %v592_v4, %v590_v3 }
  0xc0   : > { %v637_v3 = vld [vmem:[#allocation5 + $0x3f8] sm:$0xff] }
  0xc2   : > { %2105 = vmatpush1.bf16.msra.mxu0 %v2104_v10  ;;  %v594_v10 = vld [vmem:[#allocation5 + $0x2a0] sm:$0xff] }
  0xc3   : > { %2107 = vmatprep.subr.bf16.mxu0 %v2106_v11  ;;  %v596_v11 = vld [vmem:[#allocation5 + $0x2b0] sm:$0xff] }
  0xc4   : > { %v2144_v14 = vpack.c.bf16 %v596_v11, %v594_v10  ;;  %v2184_v10 = vpack.c.bf16 %v636_v7, %v634_v6  ;;  %v675_v6 = vld [vmem:[#allocation5 + $0x528] sm:$0xff]  ;;  %v677_v7 = vld [vmem:[#allocation5 + $0x538] sm:$0xff] }
  0xc6   : > { %2109 = vmatpush1.bf16.msra.mxu0 %v2108_v16  ;;  %v598_v16 = vld [vmem:[#allocation5 + $0x2c0] sm:$0xff] }
  0xc7   : > { %2111 = vmatprep.subr.bf16.mxu0 %v2110_v17  ;;  %v600_v17 = vld [vmem:[#allocation5 + $0x2d0] sm:$0xff] }
  0xc8   : > { %v2148_v20 = vpack.c.bf16 %v600_v17, %v598_v16  ;;  %v488_v16 = vld [vmem:[%s3114_s29 + $0x10] sm:$0xff]  ;;  %v2188_v17 = vpack.c.bf16 %v640_v13, %v638_v12  ;;  %v679_v12 = vld [vmem:[#allocation5 + $0x548] sm:$0xff]  ;;  %v681_v13 = vld [vmem:[#allocation5 + $0x558] sm:$0xff] }
  0xca   : > { %2113 = vmatpush1.bf16.msra.mxu0 %v2112_v22  ;;  %v602_v22 = vld [vmem:[#allocation5 + $0x2e0] sm:$0xff] }
  0xcb   : > { %2115 = vmatprep.subr.bf16.mxu0 %v2114_v23  ;;  %v604_v23 = vld [vmem:[#allocation5 + $0x2f0] sm:$0xff] }
  0xcc   : > { %v2152_v26 = vpack.c.bf16 %v604_v23, %v602_v22  ;;  %v647_v22 = vld [vmem:[#allocation5 + $0x448] sm:$0xff]  ;;  %v649_v23 = vld [vmem:[#allocation5 + $0x458] sm:$0xff] }
  0xce   : > { %2117 = vmatpush1.bf16.msra.mxu0 %v2116_v28  ;;  %v606_v28 = vld [vmem:[#allocation5 + $0x300] sm:$0xff] }
  0xcf   : > { %2119 = vmatprep.subr.bf16.mxu0 %v2118_v29  ;;  %v608_v29 = vld [vmem:[#allocation5 + $0x310] sm:$0xff] }
  0xd0   : > { %v2156_v32 = vpack.c.bf16 %v608_v29, %v606_v28  ;;  %v648_v28 = vld [vmem:[#allocation5 + $0x450] sm:$0xff]  ;;  %v501_v29 = vld [vmem:[%s3114_s29 + $0x78] sm:$0xff] }
  0xd2   : > { %2121 = vmatpush1.bf16.msra.mxu0 %v2120_v34  ;;  %v610_v34 = vld [vmem:[#allocation5 + $0x320] sm:$0xff] }
  0xd3   : > { %2123 = vmatprep.subr.bf16.mxu0 %v2122_v35  ;;  %v612_v35 = vld [vmem:[#allocation5 + $0x330] sm:$0xff] }
  0xd4   : > { %v2160_v38 = vpack.c.bf16 %v612_v35, %v610_v34  ;;  %v2198_v34 = vpack.c.bf16 %v653_v31, %v651_v30  ;;  %v650_v35 = vld [vmem:[#allocation5 + $0x460] sm:$0xff]  ;;  %v691_v30 = vld [vmem:[#allocation5 + $0x5a8] sm:$0xff]  ;;  %v693_v31 = vld [vmem:[#allocation5 + $0x5b8] sm:$0xff] }
  0xd5   : > { %779 = vmatmul.mubr.f32.vlgmr.msra.gmra.mrb[0].mxu0 %v486_v40  ;;  %v614_v40 = vld [vmem:[#allocation5 + $0x340] sm:$0xff] }
  0xd6   : > { %2125 = vmatpush1.bf16.msra.mxu0 %v2124_v41  ;;  %784 = vmatprep.mubr.f32.mxu0 %v493_v45  ;;  %v616_v41 = vld [vmem:[#allocation5 + $0x350] sm:$0xff] }
  0xd7   : > { %2127 = vmatprep.subr.bf16.mxu0 %v2126_v42  ;;  %v619_v42 = vld [vmem:[#allocation5 + $0x368] sm:$0xff]  ;;  %v2164_v44 = vpack.c.bf16 %v616_v41, %v614_v40  ;;  %v2200_v40 = vpack.c.bf16 %v652_v36, %v650_v35  ;;  %v506_v41 = vld [vmem:[%s3114_s29 + $0xa0] sm:$0xff]  ;;  %v692_v35 = vld [vmem:[#allocation5 + $0x5b0] sm:$0xff] }
  0xd8   : > { %v2166_v45 = vpack.c.bf16 %v621_v43, %v619_v42  ;;  %v654_v43 = vld [vmem:[#allocation5 + $0x480] sm:$0xff]  ;;  %v695_v36 = vld [vmem:[#allocation5 + $0x5c8] sm:$0xff] }
  0xd9   : > { %785 = vmatmul.mubr.f32.gmra.mrb[2].mxu0 %v492_v49  ;;  %v625_v49 = vld [vmem:[#allocation5 + $0x398] sm:$0xff] }
  0xda   : > { %2129 = vmatpush1.bf16.msra.mxu0 %v2128_v48  ;;  %790 = vmatprep.mubr.f32.mxu0 %v499_v53  ;;  %v623_v48 = vld [vmem:[#allocation5 + $0x388] sm:$0xff]  ;;  %v624_v53 = vld [vmem:[#allocation5 + $0x390] sm:$0xff] }
  0xdb   : > { %2131 = vmatprep.subr.bf16.mxu0 %v2130_v50  ;;  %v2168_v50 = vpack.c.bf16 %v620_v47, %v618_v46  ;;  %v2170_v51 = vpack.c.bf16 %v625_v49, %v623_v48  ;;  %v659_v46 = vld [vmem:[#allocation5 + $0x4a8] sm:$0xff]  ;;  %v661_v47 = vld [vmem:[#allocation5 + $0x4b8] sm:$0xff] }
  0xdc   : > { %v2206_v49 = vpack.c.bf16 %v661_v47, %v659_v46  ;;  %v698_v46 = vld [vmem:[#allocation5 + $0x5e0] sm:$0xff]  ;;  %v700_v47 = vld [vmem:[#allocation5 + $0x5f0] sm:$0xff] }
  0xdd   : > { %791 = vmatmul.mubr.f32.gmra.mrb[4].mxu0 %v498_v57  ;;  %v2174_v57 = vpack.c.bf16 %v629_v55, %v627_v54 }
  0xde   : > { %2133 = vmatpush1.bf16.msra.mxu0 %v2132_v56  ;;  %796 = vmatprep.mubr.f32.mxu0 %v505_v61  ;;  %v2172_v56 = vpack.c.bf16 %v624_v53, %v622_v52  ;;  %v633_v61 = vld [vmem:[#allocation5 + $0x3d8] sm:$0xff]  ;;  %v663_v52 = vld [vmem:[#allocation5 + $0x4c8] sm:$0xff] }
  0xdf   : > { %2135 = vmatprep.subr.bf16.mxu0 %v2134_v58  ;;  %v626_v58 = vld [vmem:[#allocation5 + $0x3a0] sm:$0xff]  ;;  %v2178_v63 = vpack.c.bf16 %v633_v61, %v631_v60  ;;  %v665_v53 = vld [vmem:[#allocation5 + $0x4d8] sm:$0xff] }
  0xe0   : > { %v2176_v62 = vpack.c.bf16 %v628_v59, %v626_v58  ;;  %v2210_v55 = vpack.c.bf16 %v665_v53, %v663_v52  ;;  %v667_v58 = vld [vmem:[#allocation5 + $0x4e8] sm:$0xff]  ;;  %v669_v59 = vld [vmem:[#allocation5 + $0x4f8] sm:$0xff]  ;;  %v989_v52 = vld [vmem:[#allocation7] sm:$0xff] }
  0xe1   : > { %797 = vmatmul.mubr.f32.gmra.mrb[6].mxu0 %v504_v1  ;;  %v632_v1 = vld [vmem:[#allocation5 + $0x3d0] sm:$0xff]  ;;  %v2214_v61 = vpack.c.bf16 %v669_v59, %v667_v58  ;;  %v990_v53 = vld [vmem:[#allocation7 + $0x8] sm:$0xff]  ;;  %v497_v58 = vld [vmem:[%s3114_s29 + $0x58] sm:$0xff] }
  0xe2   : > { %2137 = vmatpush1.bf16.msra.mxu0 %v2136_v0  ;;  %867 = vmatprep.mubr.f32.mxu0 %v489_v5  ;;  %v630_v0 = vld [vmem:[#allocation5 + $0x3c0] sm:$0xff] }
  0xe3   : > { %2139 = vmatprep.subr.bf16.mxu0 %v2138_v2  ;;  %v635_v2 = vld [vmem:[#allocation5 + $0x3e8] sm:$0xff]  ;;  %v2180_v4 = vpack.c.bf16 %v632_v1, %v630_v0  ;;  %v673_v1 = vld [vmem:[#allocation5 + $0x518] sm:$0xff] }
  0xe4   : > { %v2182_v5 = vpack.c.bf16 %v637_v3, %v635_v2  ;;  %v671_v0 = vld [vmem:[#allocation5 + $0x508] sm:$0xff] }
  0xe5   : > { %v2218_v3 = vpack.c.bf16 %v673_v1, %v671_v0  ;;  %v496_v0 = vld [vmem:[%s3114_s29 + $0x50] sm:$0xff] }
  0xe6   : > { %2141 = vmatpush1.bf16.msra.mxu0 %v2140_v8  ;;  %v639_v8 = vld [vmem:[#allocation5 + $0x408] sm:$0xff] }
  0xe7   : > { %2143 = vmatprep.subr.bf16.mxu0 %v2142_v9  ;;  %v641_v9 = vld [vmem:[#allocation5 + $0x418] sm:$0xff] }
  0xe8   : > { %v2186_v11 = vpack.c.bf16 %v641_v9, %v639_v8  ;;  %v2222_v9 = vpack.c.bf16 %v677_v7, %v675_v6  ;;  %v1011_v6 = vld [vmem:[#allocation7 + $0xb0] sm:$0xff]  ;;  %v1012_v7 = vld [vmem:[#allocation7 + $0xb8] sm:$0xff] }
  0xea   : > { %2145 = vmatpush1.bf16.msra.mxu0 %v2144_v14  ;;  %v643_v14 = vld [vmem:[#allocation5 + $0x428] sm:$0xff] }
  0xeb   : > { %2147 = vmatprep.subr.bf16.mxu0 %v2146_v15  ;;  %v645_v15 = vld [vmem:[#allocation5 + $0x438] sm:$0xff] }
  0xec   : > { %v2190_v18 = vpack.c.bf16 %v645_v15, %v643_v14  ;;  %v2226_v15 = vpack.c.bf16 %v681_v13, %v679_v12  ;;  %v995_v12 = vld [vmem:[#allocation7 + $0x30] sm:$0xff]  ;;  %v996_v13 = vld [vmem:[#allocation7 + $0x38] sm:$0xff] }
  0xee   : > { %2149 = vmatpush1.bf16.msra.mxu0 %v2148_v20  ;;  %v644_v20 = vld [vmem:[#allocation5 + $0x430] sm:$0xff] }
  0xef   : > { %2151 = vmatprep.subr.bf16.mxu0 %v2150_v21  ;;  %v495_v21 = vld [vmem:[%s3114_s29 + $0x48] sm:$0xff]  ;;  %v2192_v24 = vpack.c.bf16 %v644_v20, %v642_v19  ;;  %v685_v19 = vld [vmem:[#allocation5 + $0x578] sm:$0xff] }
  0xf2   : > { %2153 = vmatpush1.bf16.msra.mxu0 %v2152_v26  ;;  %v2194_v26 = vpack.c.bf16 %v649_v23, %v647_v22  ;;  %v682_v22 = vld [vmem:[#allocation5 + $0x560] sm:$0xff]  ;;  %v684_v23 = vld [vmem:[#allocation5 + $0x570] sm:$0xff] }
  0xf3   : > { %2155 = vmatprep.subr.bf16.mxu0 %v2154_v27  ;;  %v646_v27 = vld [vmem:[#allocation5 + $0x440] sm:$0xff] }
  0xf6   : > { %2157 = vmatpush1.bf16.msra.mxu0 %v2156_v32  ;;  %v2196_v32 = vpack.c.bf16 %v648_v28, %v646_v27  ;;  %v686_v28 = vld [vmem:[#allocation5 + $0x580] sm:$0xff] }
  0xf7   : > { %2159 = vmatprep.subr.bf16.mxu0 %v2158_v33  ;;  %v500_v33 = vld [vmem:[%s3114_s29 + $0x70] sm:$0xff] }
  0xfa   : > { %2161 = vmatpush1.bf16.msra.mxu0 %v2160_v38  ;;  %v655_v38 = vld [vmem:[#allocation5 + $0x488] sm:$0xff] }
  0xfb   : > { %2163 = vmatprep.subr.bf16.mxu0 %v2162_v39  ;;  %v657_v39 = vld [vmem:[#allocation5 + $0x498] sm:$0xff] }
  0xfc   : > { %v2202_v42 = vpack.c.bf16 %v657_v39, %v655_v38 }
  0xfe   : > { %2165 = vmatpush1.bf16.msra.mxu0 %v2164_v44  ;;  %v656_v44 = vld [vmem:[#allocation5 + $0x490] sm:$0xff] }
  0xff   : > { %2167 = vmatprep.subr.bf16.mxu0 %v2166_v45  ;;  %v491_v45 = vld [vmem:[%s3114_s29 + $0x28] sm:$0xff]  ;;  %v2204_v48 = vpack.c.bf16 %v656_v44, %v654_v43  ;;  %v701_v43 = vld [vmem:[#allocation5 + $0x5f8] sm:$0xff] }
 0x102   : > { %2169 = vmatpush1.bf16.msra.mxu0 %v2168_v50  ;;  %v658_v50 = vld [vmem:[#allocation5 + $0x4a0] sm:$0xff] }
 0x103   : > { %2171 = vmatprep.subr.bf16.mxu0 %v2170_v51  ;;  %v660_v51 = vld [vmem:[#allocation5 + $0x4b0] sm:$0xff] }
 0x104   : > { %v2208_v54 = vpack.c.bf16 %v660_v51, %v658_v50  ;;  %v2248_v50 = vpack.c.bf16 %v700_v47, %v698_v46 }
 0x106   : > { %2173 = vmatpush1.bf16.msra.mxu0 %v2172_v56  ;;  %v662_v56 = vld [vmem:[#allocation5 + $0x4c0] sm:$0xff] }
 0x107   : > { %2175 = vmatprep.subr.bf16.mxu0 %v2174_v57  ;;  %v664_v57 = vld [vmem:[#allocation5 + $0x4d0] sm:$0xff] }
 0x108   : > { %v2212_v60 = vpack.c.bf16 %v664_v57, %v662_v56  ;;  %v490_v56 = vld [vmem:[%s3114_s29 + $0x20] sm:$0xff]  ;;  %v2252_v57 = vpack.c.bf16 %v990_v53, %v989_v52 }
 0x10a   : > { %2177 = vmatpush1.bf16.msra.mxu0 %v2176_v62  ;;  %v666_v62 = vld [vmem:[#allocation5 + $0x4e0] sm:$0xff] }
 0x10b   : > { %2179 = vmatprep.subr.bf16.mxu0 %v2178_v63  ;;  %v668_v63 = vld [vmem:[#allocation5 + $0x4f0] sm:$0xff] }
 0x10c   : > { %v2216_v2 = vpack.c.bf16 %v668_v63, %v666_v62  ;;  %v1009_v62 = vld [vmem:[#allocation7 + $0xa0] sm:$0xff]  ;;  %v1010_v63 = vld [vmem:[#allocation7 + $0xa8] sm:$0xff] }
 0x10e   : > { %2181 = vmatpush1.bf16.msra.mxu0 %v2180_v4  ;;  %v670_v4 = vld [vmem:[#allocation5 + $0x500] sm:$0xff] }
 0x10f   : > { %2183 = vmatprep.subr.bf16.mxu0 %v2182_v5  ;;  %v672_v5 = vld [vmem:[#allocation5 + $0x510] sm:$0xff] }
 0x110   : > { %v2220_v8 = vpack.c.bf16 %v672_v5, %v670_v4  ;;  %v993_v4 = vld [vmem:[#allocation7 + $0x20] sm:$0xff]  ;;  %v994_v5 = vld [vmem:[#allocation7 + $0x28] sm:$0xff] }
 0x112   : > { %2185 = vmatpush1.bf16.msra.mxu0 %v2184_v10  ;;  %v674_v10 = vld [vmem:[#allocation5 + $0x520] sm:$0xff] }
 0x113   : > { %2187 = vmatprep.subr.bf16.mxu0 %v2186_v11  ;;  %v676_v11 = vld [vmem:[#allocation5 + $0x530] sm:$0xff] }
 0x114   : > { %v2224_v14 = vpack.c.bf16 %v676_v11, %v674_v10  ;;  %v509_v10 = vld [vmem:[%s3114_s29 + $0xb8] sm:$0xff]  ;;  %v2262_v11 = vpack.c.bf16 %v1012_v7, %v1011_v6  ;;  %v1154_v7 = vld [vmem:[%s3417_s6 + $0x8] sm:$0xff] }
 0x115   : > { %868 = vmatmul.mubr.f32.vlgmr.msra.gmra.mrb[0].mxu0 %v488_v16  ;;  %v678_v16 = vld [vmem:[#allocation5 + $0x540] sm:$0xff] }
 0x116   : > { %2189 = vmatpush1.bf16.msra.mxu0 %v2188_v17  ;;  %873 = vmatprep.mubr.f32.mxu0 %v495_v21  ;;  %v680_v17 = vld [vmem:[#allocation5 + $0x550] sm:$0xff] }
 0x117   : > { %2191 = vmatprep.subr.bf16.mxu0 %v2190_v18  ;;  %v683_v18 = vld [vmem:[#allocation5 + $0x568] sm:$0xff]  ;;  %v2228_v20 = vpack.c.bf16 %v680_v17, %v678_v16  ;;  %v508_v16 = vld [vmem:[%s3114_s29 + $0xb0] sm:$0xff]  ;;  %v2264_v17 = vpack.c.bf16 %v996_v13, %v995_v12 }
 0x118   : > { %v2230_v21 = vpack.c.bf16 %v685_v19, %v683_v18  ;;  %v997_v19 = vld [vmem:[#allocation7 + $0x40] sm:$0xff] }
 0x119   : > { %874 = vmatmul.mubr.f32.gmra.mrb[2].mxu0 %v494_v25  ;;  %v689_v25 = vld [vmem:[#allocation5 + $0x598] sm:$0xff] }
 0x11a   : > { %2193 = vmatpush1.bf16.msra.mxu0 %v2192_v24  ;;  %879 = vmatprep.mubr.f32.mxu0 %v501_v29  ;;  %v687_v24 = vld [vmem:[#allocation5 + $0x588] sm:$0xff]  ;;  %v688_v29 = vld [vmem:[#allocation5 + $0x590] sm:$0xff] }
 0x11b   : > { %2195 = vmatprep.subr.bf16.mxu0 %v2194_v26  ;;  %v2232_v26 = vpack.c.bf16 %v684_v23, %v682_v22  ;;  %v2234_v27 = vpack.c.bf16 %v689_v25, %v687_v24  ;;  %v1016_v22 = vld [vmem:[#allocation7 + $0xd8] sm:$0xff]  ;;  %v999_v25 = vld [vmem:[#allocation7 + $0x50] sm:$0xff] }
 0x11d   : > { %880 = vmatmul.mubr.f32.gmra.mrb[4].mxu0 %v500_v33  ;;  %v2238_v33 = vpack.c.bf16 %v693_v31, %v691_v30  ;;  %v1001_v31 = vld [vmem:[#allocation7 + $0x60] sm:$0xff] }
 0x11e   : > { %2197 = vmatpush1.bf16.msra.mxu0 %v2196_v32  ;;  %885 = vmatprep.mubr.f32.mxu0 %v507_v37  ;;  %v2236_v32 = vpack.c.bf16 %v688_v29, %v686_v28  ;;  %v697_v37 = vld [vmem:[#allocation5 + $0x5d8] sm:$0xff]  ;;  %v1018_v28 = vld [vmem:[#allocation7 + $0xe8] sm:$0xff] }
 0x11f   : > { %2199 = vmatprep.subr.bf16.mxu0 %v2198_v34  ;;  %v690_v34 = vld [vmem:[#allocation5 + $0x5a0] sm:$0xff]  ;;  %v2242_v39 = vpack.c.bf16 %v697_v37, %v695_v36  ;;  %v1003_v37 = vld [vmem:[#allocation7 + $0x70] sm:$0xff] }
 0x120   : > { %v2240_v38 = vpack.c.bf16 %v692_v35, %v690_v34  ;;  %v1019_v34 = vld [vmem:[#allocation7 + $0xf0] sm:$0xff]  ;;  %v1020_v35 = vld [vmem:[#allocation7 + $0xf8] sm:$0xff] }
 0x121   : > { %886 = vmatmul.mubr.f32.gmra.mrb[6].mxu0 %v506_v41  ;;  %v696_v41 = vld [vmem:[#allocation5 + $0x5d0] sm:$0xff]  ;;  %v2278_v36 = vpack.c.bf16 %v1020_v35, %v1019_v34  ;;  %v2844_v34 = vmov 0.0  }
 0x122   : > { %2201 = vmatpush1.bf16.msra.mxu0 %v2200_v40  ;;  %956 = vmatprep.mubr.f32.mxu0 %v491_v45  ;;  %v694_v40 = vld [vmem:[#allocation5 + $0x5c0] sm:$0xff] }
 0x123   : > { %2203 = vmatprep.subr.bf16.mxu0 %v2202_v42  ;;  %v699_v42 = vld [vmem:[#allocation5 + $0x5e8] sm:$0xff]  ;;  %v2244_v44 = vpack.c.bf16 %v696_v41, %v694_v40  ;;  %v704_v40 = vlaneseq  ;;  %1250 = vmatprep.mubr.f32.mxu1 %v2844_v34 }
 0x124   : > { %v2246_v45 = vpack.c.bf16 %v701_v43, %v699_v42  ;;  %v702_v43 = vld [vmem:[%s3414_s3] sm:$0x3] }
 0x125   : > { %v3152_v41 = vshrl.u32 %v704_v40, 7 }
 0x126   : > { %2205 = vmatpush1.bf16.msra.mxu0 %v2204_v48  ;;  %v1005_v48 = vld [vmem:[#allocation7 + $0x80] sm:$0xff] }
 0x127   : > { %2207 = vmatprep.subr.bf16.mxu0 %v2206_v49  ;;  %v1006_v49 = vld [vmem:[#allocation7 + $0x88] sm:$0xff]  ;;  %v3155_v42 = vsub.s32 0, %v3152_v41 }
 0x128   : > { %v2250_v51 = vpack.c.bf16 %v1006_v49, %v1005_v48 }
 0x12a   : > { %2209 = vmatpush1.bf16.msra.mxu0 %v2208_v54  ;;  %v1007_v54 = vld [vmem:[#allocation7 + $0x90] sm:$0xff] }
 0x12b   : > { %2211 = vmatprep.subr.bf16.mxu0 %v2210_v55  ;;  %v1008_v55 = vld [vmem:[#allocation7 + $0x98] sm:$0xff] }
 0x12c   : > { %v2254_v59 = vpack.c.bf16 %v1008_v55, %v1007_v54 }
 0x12e   : > { %2213 = vmatpush1.bf16.msra.mxu0 %v2212_v60  ;;  %v991_v60 = vld [vmem:[#allocation7 + $0x10] sm:$0xff] }
 0x12f   : > { %2215 = vmatprep.subr.bf16.mxu0 %v2214_v61  ;;  %v992_v61 = vld [vmem:[#allocation7 + $0x18] sm:$0xff] }
 0x130   : > { %v2256_v1 = vpack.c.bf16 %v992_v61, %v991_v60 }
 0x132   : > { %2217 = vmatpush1.bf16.msra.mxu0 %v2216_v2  ;;  %v503_v2 = vld [vmem:[%s3114_s29 + $0x88] sm:$0xff] }
 0x133   : > { %2219 = vmatprep.subr.bf16.mxu0 %v2218_v3  ;;  %v2258_v3 = vpack.c.bf16 %v1010_v63, %v1009_v62 }
 0x136   : > { %2221 = vmatpush1.bf16.msra.mxu0 %v2220_v8  ;;  %v502_v8 = vld [vmem:[%s3114_s29 + $0x80] sm:$0xff]  ;;  %s3310_s29 = scalar_lea.hbm %s3454_s27, %s2013_s10 }
 0x137   : > { %2223 = vmatprep.subr.bf16.mxu0 %v2222_v9  ;;  %v2260_v9 = vpack.c.bf16 %v994_v5, %v993_v4 }
 0x13a   : > { %2225 = vmatpush1.bf16.msra.mxu0 %v2224_v14  ;;  %v1013_v14 = vld [vmem:[#allocation7 + $0xc0] sm:$0xff] }
 0x13b   : > { %2227 = vmatprep.subr.bf16.mxu0 %v2226_v15  ;;  %v1014_v15 = vld [vmem:[#allocation7 + $0xc8] sm:$0xff] }
 0x13c   : > { %v2266_v18 = vpack.c.bf16 %v1014_v15, %v1013_v14  ;;  %v2000_v14 = vld [vmem:[%s3416_s5] ss:$0 sm:$0xff] }
 0x13e   : > { %2229 = vmatpush1.bf16.msra.mxu0 %v2228_v20  ;;  %v998_v20 = vld [vmem:[#allocation7 + $0x48] sm:$0xff] }
 0x13f   : > { %2231 = vmatprep.subr.bf16.mxu0 %v2230_v21  ;;  %v1015_v21 = vld [vmem:[#allocation7 + $0xd0] sm:$0xff]  ;;  %v2268_v23 = vpack.c.bf16 %v998_v20, %v997_v19  ;;  %v1158_v20 = vld [vmem:[%s3417_s6 + $0x28] sm:$0xff] }
 0x140   : > { %v2270_v24 = vpack.c.bf16 %v1016_v22, %v1015_v21  ;;  %v1160_v21 = vld [vmem:[%s3417_s6 + $0x38] sm:$0xff] }
 0x142   : > { %2233 = vmatpush1.bf16.msra.mxu0 %v2232_v26  ;;  %v1000_v26 = vld [vmem:[#allocation7 + $0x58] sm:$0xff] }
 0x143   : > { %2235 = vmatprep.subr.bf16.mxu0 %v2234_v27  ;;  %v1017_v27 = vld [vmem:[#allocation7 + $0xe0] sm:$0xff]  ;;  %v2272_v29 = vpack.c.bf16 %v1000_v26, %v999_v25  ;;  %v1159_v26 = vld [vmem:[%s3417_s6 + $0x30] sm:$0xff] }
 0x144   : > { %v2274_v30 = vpack.c.bf16 %v1018_v28, %v1017_v27  ;;  %v1157_v25 = vld [vmem:[%s3417_s6 + $0x20] sm:$0xff] }
 0x145   : > { %v2288_v27 = vpack.c.bf16 %v1159_v26, %v1157_v25  ;;  %v1332_v25 = vld [vmem:[#allocation8 + $0x188] sm:$0xff]  ;;  %v1338_v26 = vld [vmem:[#allocation8 + $0x1b8] sm:$0xff] }
 0x146   : > { %2237 = vmatpush1.bf16.msra.mxu0 %v2236_v32  ;;  %v1002_v32 = vld [vmem:[#allocation7 + $0x68] sm:$0xff] }
 0x147   : > { %2239 = vmatprep.subr.bf16.mxu0 %v2238_v33  ;;  %v2276_v33 = vpack.c.bf16 %v1002_v32, %v1001_v31 }
 0x14a   : > { %2241 = vmatpush1.bf16.msra.mxu0 %v2240_v38  ;;  %v1004_v38 = vld [vmem:[#allocation7 + $0x78] sm:$0xff] }
 0x14b   : > { %2243 = vmatprep.subr.bf16.mxu0 %v2242_v39  ;;  %v2280_v39 = vpack.c.bf16 %v1004_v38, %v1003_v37 }
 0x14e   : > { %2245 = vmatpush1.bf16.msra.mxu0 %v2244_v44  ;;  %v3161_v44 = vsub.s32 1, %v3152_v41 }
 0x14f   : > { %2247 = vmatprep.subr.bf16.mxu0 %v2246_v45  ;;  %v707_v45 = vrot.slane %v702_v43, %v3155_v42 }
 0x150   : > { %v711_v46 = vrot.slane %v702_v43, %v3161_v44 }
 0x152   : > { %2249 = vmatpush1.bf16.msra.mxu0 %v2248_v50 }
 0x153   : > { %2251 = vmatprep.subr.bf16.mxu0 %v2250_v51 }
 0x155   : > { %957 = vmatmul.mubr.f32.vlgmr.msra.gmra.mrb[0].mxu0 %v490_v56 }
 0x156   : > { %962 = vmatprep.mubr.f32.mxu0 %v497_v58  ;;  %2253 = vmatpush3.bf16.msra.mxu0 %v2252_v57 }
 0x157   : > { %2255 = vmatprep.subr.bf16.mxu0 %v2254_v59 }
 0x159   : > { %963 = vmatmul.mubr.f32.gmra.mrb[2].mxu0 %v496_v0 }
 0x15a   : > { %968 = vmatprep.mubr.f32.mxu0 %v503_v2  ;;  %2257 = vmatpush3.bf16.msra.mxu0 %v2256_v1 }
 0x15b   : > { %2259 = vmatprep.subr.bf16.mxu0 %v2258_v3 }
 0x15d   : > { %969 = vmatmul.mubr.f32.gmra.mrb[4].mxu0 %v502_v8  ;;  %v1156_v8 = vld [vmem:[%s3417_s6 + $0x18] sm:$0xff] }
 0x15e   : > { %974 = vmatprep.mubr.f32.mxu0 %v509_v10  ;;  %2261 = vmatpush3.bf16.msra.mxu0 %v2260_v9  ;;  %v1153_v9 = vld [vmem:[%s3417_s6] sm:$0xff]  ;;  %v2282_v10 = vpack.c.bf16 %v1156_v8, %v1154_v7  ;;  %v1127_v8 = vld [vmem:[%s3220_s25 + $0x10] sm:$0xff] }
 0x15f   : > { %2263 = vmatprep.subr.bf16.mxu0 %v2262_v11  ;;  %v1155_v11 = vld [vmem:[%s3417_s6 + $0x10] sm:$0xff] }
 0x160   : > { %v2284_v12 = vpack.c.bf16 %v1155_v11, %v1153_v9  ;;  %2283 = vmatprep.subr.bf16.mxu1 %v2282_v10 }
 0x161   : > { %975 = vmatmul.mubr.f32.gmra.mrb[6].mxu0 %v508_v16 }
 0x162   : > { %2265 = vmatpush3.bf16.msra.mxu0 %v2264_v17  ;;  %2285 = vmatpush1.bf16.msra.mxu1 %v2284_v12  ;;  %v1307_v12 = vld [vmem:[#allocation8 + $0xc0] sm:$0xff] }
 0x163   : > { %2267 = vmatprep.subr.bf16.mxu0 %v2266_v18 }
 0x166   : > { %2269 = vmatpush3.bf16.msra.mxu0 %v2268_v23 }
 0x167   : > { %2271 = vmatprep.subr.bf16.mxu0 %v2270_v24  ;;  %v2286_v24 = vpack.c.bf16 %v1160_v21, %v1158_v20 }
 0x169   : > { %2287 = vmatprep.subr.bf16.mxu1 %v2286_v24 }
 0x16a   : > { %2273 = vmatpush3.bf16.msra.mxu0 %v2272_v29  ;;  %2289 = vmatpush1.bf16.msra.mxu1 %v2288_v27 }
 0x16b   : > { %2275 = vmatprep.subr.bf16.mxu0 %v2274_v30 }
 0x16e   : > { %2277 = vmatpush3.bf16.msra.mxu0 %v2276_v33 }
 0x16f   : > { %2279 = vmatprep.subr.bf16.mxu0 %v2278_v36 }
 0x172   : > { %2281 = vmatpush3.bf16.msra.mxu0 %v2280_v39 }
 0x228   : > { %v958_v47 = vpop.f32.mrb[0].mxu0 }
 0x229   : > { %v2482_v48 = vadd.f32 %v958_v47, %v707_v45  ;;  %v960_v49 = vpop.f32.mrb[1].mxu0 }
 0x22a   : > { %v2483_v50 = vadd.f32 %v960_v49, %v711_v46 }
 0x22b   : > { %v981_v53 = vmax.f32 %v2482_v48, 0.0 }
 0x22c   : > { %v982_v51 = vmax.f32 %v2483_v50, 0.0  ;;  %v964_v52 = vpop.f32.mrb[2].mxu0  ;;  %v1284_v50 = vld [vmem:[#allocation8 + $0x8] sm:$0xff] }
 0x22d   : > { %v2484_v54 = vadd.f32 %v964_v52, %v707_v45  ;;  %v966_v55 = vpop.f32.mrb[3].mxu0 }
 0x22e   : > { %v2485_v56 = vadd.f32 %v966_v55, %v711_v46  ;;  %1092 = vmatprep.mubr.f32.mxu0 %v982_v51  ;;  %v1290_v51 = vld [vmem:[#allocation8 + $0x38] sm:$0xff]  ;;  %v1125_v55 = vld [vmem:[%s3220_s25] sm:$0xff] }
 0x22f   : > { %1093 = vmatmul.mubr.f32.vlgmr.msra.gmra.mrb[8].mxu0 %v981_v53  ;;  %v983_v59 = vmax.f32 %v2484_v54, 0.0  ;;  %v2290_v52 = vpack.c.bf16 %v1290_v51, %v1284_v50 }
 0x230   : > { %v984_v57 = vmax.f32 %v2485_v56, 0.0  ;;  %v970_v58 = vpop.f32.mrb[4].mxu0  ;;  %v1283_v56 = vld [vmem:[#allocation8] sm:$0xff] }
 0x231   : > { %v2486_v60 = vadd.f32 %v970_v58, %v707_v45  ;;  %v972_v61 = vpop.f32.mrb[5].mxu0  ;;  %2291 = vmatprep.subr.bf16.mxu1 %v2290_v52  ;;  %v1367_v52 = vld [vmem:[#allocation8 + $0x2a0] sm:$0xff] }
 0x232   : > { %v2487_v62 = vadd.f32 %v972_v61, %v711_v46  ;;  %1097 = vmatprep.mubr.f32.mxu0 %v984_v57  ;;  %v1289_v57 = vld [vmem:[#allocation8 + $0x30] sm:$0xff] }
 0x233   : > { %1098 = vmatmul.mubr.f32.gmra.mrb[10].mxu0 %v983_v59  ;;  %v985_v1 = vmax.f32 %v2486_v60, 0.0  ;;  %v1296_v59 = vld [vmem:[#allocation8 + $0x68] sm:$0xff]  ;;  %v1302_v60 = vld [vmem:[#allocation8 + $0x98] sm:$0xff] }
 0x234   : > { %v986_v63 = vmax.f32 %v2487_v62, 0.0  ;;  %v976_v0 = vpop.f32.mrb[6].mxu0  ;;  %v1126_v62 = vld [vmem:[%s3220_s25 + $0x8] sm:$0xff] }
 0x235   : > { %v2488_v2 = vadd.f32 %v976_v0, %v707_v45  ;;  %v978_v3 = vpop.f32.mrb[7].mxu0 }
 0x236   : > { %v2489_v4 = vadd.f32 %v978_v3, %v711_v46  ;;  %1102 = vmatprep.mubr.f32.mxu0 %v986_v63  ;;  %v2292_v63 = vpack.c.bf16 %v1289_v57, %v1283_v56  ;;  %v1301_v3 = vld [vmem:[#allocation8 + $0x90] sm:$0xff] }
 0x237   : > { %1103 = vmatmul.mubr.f32.gmra.mrb[12].mxu0 %v985_v1  ;;  %v987_v6 = vmax.f32 %v2488_v2, 0.0  ;;  %v2294_v1 = vpack.c.bf16 %v1302_v60, %v1296_v59  ;;  %v1295_v2 = vld [vmem:[#allocation8 + $0x60] sm:$0xff]  ;;  %v1385_v59 = vld [vmem:[#allocation8 + $0x330] sm:$0xff]  ;;  %v1392_v60 = vld [vmem:[#allocation8 + $0x368] sm:$0xff] }
 0x238   : > { %v988_v5 = vmax.f32 %v2489_v4, 0.0  ;;  %v2296_v9 = vpack.c.bf16 %v1301_v3, %v1295_v2  ;;  %v1404_v2 = vld [vmem:[#allocation8 + $0x3c8] sm:$0xff]  ;;  %v1410_v3 = vld [vmem:[#allocation8 + $0x3f8] sm:$0xff] }
 0x23a   : > { %1107 = vmatprep.mubr.f32.mxu0 %v988_v5  ;;  %v1308_v5 = vld [vmem:[#allocation8 + $0xc8] sm:$0xff] }
 0x23b   : > { %1108 = vmatmul.mubr.f32.gmra.mrb[14].mxu0 %v987_v6  ;;  %v1314_v6 = vld [vmem:[#allocation8 + $0xf8] sm:$0xff] }
 0x23c   : > { %v2298_v11 = vpack.c.bf16 %v1314_v6, %v1308_v5  ;;  %v2330_v5 = vpack.c.bf16 %v1410_v3, %v1404_v2  ;;  %v1403_v6 = vld [vmem:[#allocation8 + $0x3c0] sm:$0xff]  ;;  %v1310_v2 = vld [vmem:[#allocation8 + $0xd8] sm:$0xff]  ;;  %v1316_v3 = vld [vmem:[#allocation8 + $0x108] sm:$0xff] }
 0x302   : > { %v2046_v13 = vpop.f32.mrb[8].mxu0 }
 0x303   : > { %v2047_v15 = vpop.f32.mrb[9].mxu0 }
 0x304   : > { %v2048_v16 = vadd.f32 %v2047_v15, %v2046_v13  ;;  %v1313_v13 = vld [vmem:[#allocation8 + $0xf0] sm:$0xff]  ;;  %v1320_v15 = vld [vmem:[#allocation8 + $0x128] sm:$0xff] }
 0x306   : > { %v3181_v17 = vadd.f32 %v2048_v16, %v2000_v14  ;;  %v2049_v18 = vpop.f32.mrb[10].mxu0  ;;  %v1326_v16 = vld [vmem:[#allocation8 + $0x158] sm:$0xff] }
 0x307   : > { %v2050_v19 = vpop.f32.mrb[11].mxu0  ;;  %v2302_v21 = vpack.c.bf16 %v1326_v16, %v1320_v15  ;;  %v1434_v15 = vld [vmem:[#allocation8 + $0x4b8] sm:$0xff] }
 0x308   : > { %v1113_v22 = vmul.f32 0.5, %v3181_v17  ;;  %1798 = vst [vmem:[%s3190_s24] sm:$0xff] %v3181_v17  ;;  %v2051_v23 = vadd.f32 %v2050_v19, %v2049_v18  ;;  %v1128_v18 = vld [vmem:[%s3220_s25 + $0x18] sm:$0xff]  ;;  %v2300_v19 = vpack.c.bf16 %v1313_v13, %v1307_v12  ;;  %v1415_v12 = vld [vmem:[#allocation8 + $0x420] sm:$0xff]  ;;  %v1421_v13 = vld [vmem:[#allocation8 + $0x450] sm:$0xff]  ;;  %s2726_s25 = scalar_lea.vmem %s3305_s12, 512 }
 0x309   : > { %v2336_v16 = vpack.c.bf16 %v1421_v13, %v1415_v12  ;;  %v1315_v12 = vld [vmem:[#allocation8 + $0x100] sm:$0xff]  ;;  %p2727_p3 = scmp.ne.s32.totalorder %s3305_s12, %s2726_s25 }
 0x30a   : > { %v1117_v28 = vmul.f32 1.442695, %v1113_v22  ;;  %v3200_v29 = vadd.f32 %v2051_v23, %v2000_v14  ;;  %v2052_v30 = vpop.f32.mrb[12].mxu0  ;;  %v1319_v22 = vld [vmem:[#allocation8 + $0x120] sm:$0xff]  ;;  %v1325_v23 = vld [vmem:[#allocation8 + $0x150] sm:$0xff] }
 0x30b   : > { %v2053_v31 = vpop.f32.mrb[13].mxu0  ;;  %p2728_p7 = pnand %p2727_p3, %p3057_p5 }
 0x30c   : > { %2604 = vpow2.f32 %v1117_v28  ;;  %v1114_v32 = vmul.f32 0.5, %v3200_v29  ;;  %1799 = vst [vmem:[%s3190_s24 + $0x8] sm:$0xff] %v3200_v29  ;;  %v2054_v33 = vadd.f32 %v2053_v31, %v2052_v30  ;;  %v2304_v28 = vpack.c.bf16 %v1325_v23, %v1319_v22  ;;  %v1331_v31 = vld [vmem:[#allocation8 + $0x180] sm:$0xff] }
 0x30d   : > { %v2306_v30 = vpack.c.bf16 %v1338_v26, %v1332_v25  ;;  %v1445_v25 = vld [vmem:[#allocation8 + $0x510] sm:$0xff]  ;;  %v1452_v26 = vld [vmem:[#allocation8 + $0x548] sm:$0xff]  ;;  %p2729_p12 = pneg %p2728_p7 }
 0x30e   : > { %v1119_v35 = vmul.f32 1.442695, %v1114_v32  ;;  %v3206_v36 = vadd.f32 %v2054_v33, %v2000_v14  ;;  %v2055_v37 = vpop.f32.mrb[14].mxu0  ;;  %v1337_v32 = vld [vmem:[#allocation8 + $0x1b0] sm:$0xff]  ;;  %v1344_v33 = vld [vmem:[#allocation8 + $0x1e8] sm:$0xff] }
 0x30f   : > { %v2056_v38 = vpop.f32.mrb[15].mxu0 }
 0x310   : > { %2606 = vpow2.f32 %v1119_v35  ;;  %v1115_v39 = vmul.f32 0.5, %v3206_v36  ;;  %1800 = vst [vmem:[%s3190_s24 + $0x10] sm:$0xff] %v3206_v36  ;;  %v2057_v40 = vadd.f32 %v2056_v38, %v2055_v37  ;;  %v1350_v35 = vld [vmem:[#allocation8 + $0x218] sm:$0xff]  ;;  %v1343_v38 = vld [vmem:[#allocation8 + $0x1e0] sm:$0xff] }
 0x311   : > { %v2310_v37 = vpack.c.bf16 %v1350_v35, %v1344_v33  ;;  %v1464_v33 = vld [vmem:[#allocation8 + $0x5a8] sm:$0xff]  ;;  %v1470_v35 = vld [vmem:[#allocation8 + $0x5d8] sm:$0xff] }
 0x312   : > { %v1121_v43 = vmul.f32 1.442695, %v1115_v39  ;;  %v3211_v45 = vadd.f32 %v2057_v40, %v2000_v14  ;;  %v1349_v39 = vld [vmem:[#allocation8 + $0x210] sm:$0xff]  ;;  %v1356_v40 = vld [vmem:[#allocation8 + $0x248] sm:$0xff] }
 0x314   : > { %2608 = vpow2.f32 %v1121_v43  ;;  %v1116_v46 = vmul.f32 0.5, %v3211_v45  ;;  %1801 = vst [vmem:[%s3190_s24 + $0x18] sm:$0xff] %v3211_v45  ;;  %v2312_v43 = vpack.c.bf16 %v1349_v39, %v1343_v38  ;;  %v1469_v38 = vld [vmem:[#allocation8 + $0x5d0] sm:$0xff]  ;;  %s2846_s24 = smov [#allocation11]  }
 0x315   : > { %s2730_s30 = sshll.u32 %s2846_s24, 4  ;;  %s2731_s30 = int_to_ptr.vmem [resolvable:$false] %s2730_s30 }
 0x316   : > { %v2605_v47 = vpop.eup %2604  ;;  %v1123_v48 = vmul.f32 1.442695, %v1116_v46  ;;  %v1355_v46 = vld [vmem:[#allocation8 + $0x240] sm:$0xff]  ;;  %s2732_s11 = scalar_lea.vmem %s2731_s30, 1024  ;;  %p2733_p2 = scmp.lt.s32.totalorder %s3305_s12, %s2731_s30 }
 0x317   : > { %1133 = vrot.lane.b32.xlu0 %v2605_v47, %s2845_s2  ;;  %v1361_v47 = vld [vmem:[#allocation8 + $0x270] sm:$0xff]  ;;  %p2734_p1 = scmp.lt.s32.totalorder %s2732_s11, %s2726_s25 }
 0x318   : > { %2610 = vpow2.f32 %v1123_v48  ;;  %v1368_v48 = vld [vmem:[#allocation8 + $0x2a8] sm:$0xff]  ;;  %v2316_v50 = vpack.c.bf16 %v1361_v47, %v1355_v46 }
 0x319   : > { %p2735_p4 = por %p2734_p1, %p2733_p2 }
 0x31a   : > { %v2607_v49 = vpop.eup %2606 }
 0x31b   : > { %1135 = vrot.lane.b32.xlu0 %v2607_v49, %s2845_s2  ;;  %v1374_v49 = vld [vmem:[#allocation8 + $0x2d8] sm:$0xff]  ;;  %p2736_p9 = pnand %p2735_p4, %p2729_p12 }
 0x31c   : > { %v2318_v51 = vpack.c.bf16 %v1374_v49, %v1368_v48 }
 0x31e   : > { %v2609_v53 = vpop.eup %2608 }
 0x31f   : > { %1137 = vrot.lane.b32.xlu1 %v2609_v53, %s2845_s2  ;;  %v1373_v53 = vld [vmem:[#allocation8 + $0x2d0] sm:$0xff] }
 0x320   : > { %v2320_v56 = vpack.c.bf16 %v1373_v53, %v1367_v52  ;;  %v1291_v52 = vld [vmem:[#allocation8 + $0x40] sm:$0xff] }
 0x322   : > { %v2611_v54 = vpop.eup %2610 }
 0x323   : > { %1139 = vrot.lane.b32.xlu1 %v2611_v54, %s2845_s2  ;;  %v1380_v54 = vld [vmem:[#allocation8 + $0x308] sm:$0xff] }
 0x389   : > { %v1134_v58 = vpop.permute.xlu0 %1133 }
 0x38a   : > { %v1145_v61 = vmul.f32 %v1134_v58, %v1125_v55  ;;  %v1386_v55 = vld [vmem:[#allocation8 + $0x338] sm:$0xff]  ;;  %v1379_v58 = vld [vmem:[#allocation8 + $0x300] sm:$0xff] }
 0x38b   : > { %v2322_v57 = vpack.c.bf16 %v1386_v55, %v1380_v54  ;;  %v1298_v54 = vld [vmem:[#allocation8 + $0x78] sm:$0xff]  ;;  %v1304_v55 = vld [vmem:[#allocation8 + $0xa8] sm:$0xff] }
 0x38c   : > { %v1149_v0 = vadd.f32 %v1145_v61, %v3181_v17  ;;  %v1398_v61 = vld [vmem:[#allocation8 + $0x398] sm:$0xff] }
 0x38d   : > { %v1136_v4 = vpop.permute.xlu0 %1135 }
 0x38e   : > { %v1146_v7 = vmul.f32 %v1136_v4, %v1126_v62  ;;  %2001 = vmatmul.mubr.msk.f32.vlgmr.msra.gmra.mrb[0].mxu1 %vm1173_vm0, %v1149_v0  ;;  %v2324_v62 = vpack.c.bf16 %v1385_v59, %v1379_v58  ;;  %v1391_v0 = vld [vmem:[#allocation8 + $0x360] sm:$0xff] }
 0x38f   : > { %1256 = vmatprep.mubr.f32.mxu1 %v2844_v34  ;;  %2293 = vmatpush1.bf16.msra.mxu1 %v2292_v63  ;;  %v2326_v63 = vpack.c.bf16 %v1398_v61, %v1392_v60 }
 0x390   : > { %v1150_v10 = vadd.f32 %v1146_v7, %v3200_v29  ;;  %2295 = vmatprep.subr.bf16.mxu1 %v2294_v1  ;;  %v1397_v1 = vld [vmem:[#allocation8 + $0x390] sm:$0xff] }
 0x391   : > { %v1138_v14 = vpop.permute.xlu1 %1137  ;;  %v2328_v4 = vpack.c.bf16 %v1397_v1, %v1391_v0  ;;  %v1409_v7 = vld [vmem:[#allocation8 + $0x3f0] sm:$0xff]  ;;  %v1303_v0 = vld [vmem:[#allocation8 + $0xa0] sm:$0xff] }
 0x392   : > { %v1147_v17 = vmul.f32 %v1138_v14, %v1127_v8  ;;  %2002 = vmatmul.mubr.msk.f32.gmra.mrb[2].mxu1 %vm1173_vm0, %v1150_v10  ;;  %v1416_v8 = vld [vmem:[#allocation8 + $0x428] sm:$0xff]  ;;  %v2332_v10 = vpack.c.bf16 %v1409_v7, %v1403_v6 }
 0x393   : > { %1262 = vmatprep.mubr.f32.mxu1 %v2844_v34  ;;  %2297 = vmatpush1.bf16.msra.mxu1 %v2296_v9  ;;  %v1422_v9 = vld [vmem:[#allocation8 + $0x458] sm:$0xff]  ;;  %v1428_v14 = vld [vmem:[#allocation8 + $0x488] sm:$0xff] }
 0x394   : > { %v1151_v20 = vadd.f32 %v1147_v17, %v3206_v36  ;;  %2299 = vmatprep.subr.bf16.mxu1 %v2298_v11  ;;  %v2308_v36 = vpack.c.bf16 %v1337_v32, %v1331_v31  ;;  %v2334_v11 = vpack.c.bf16 %v1422_v9, %v1416_v8  ;;  %v2338_v17 = vpack.c.bf16 %v1434_v15, %v1428_v14  ;;  %v1457_v31 = vld [vmem:[#allocation8 + $0x570] sm:$0xff]  ;;  %v1322_v14 = vld [vmem:[#allocation8 + $0x138] sm:$0xff]  ;;  %v1328_v15 = vld [vmem:[#allocation8 + $0x168] sm:$0xff] }
 0x395   : > { %v1140_v24 = vpop.permute.xlu1 %1139 }
 0x396   : > { %v1148_v27 = vmul.f32 %v1140_v24, %v1128_v18  ;;  %2003 = vmatmul.mubr.msk.f32.gmra.mrb[4].mxu1 %vm1173_vm0, %v1151_v20  ;;  %v1427_v18 = vld [vmem:[#allocation8 + $0x480] sm:$0xff]  ;;  %v1440_v20 = vld [vmem:[#allocation8 + $0x4e8] sm:$0xff] }
 0x397   : > { %1268 = vmatprep.mubr.f32.mxu1 %v2844_v34  ;;  %2301 = vmatpush1.bf16.msra.mxu1 %v2300_v19  ;;  %v1362_v34 = vld [vmem:[#allocation8 + $0x278] sm:$0xff]  ;;  %v1433_v19 = vld [vmem:[#allocation8 + $0x4b0] sm:$0xff]  ;;  %v1439_v24 = vld [vmem:[#allocation8 + $0x4e0] sm:$0xff] }
 0x398   : > { %v1152_v29 = vadd.f32 %v1148_v27, %v3211_v45  ;;  %2303 = vmatprep.subr.bf16.mxu1 %v2302_v21  ;;  %v2314_v45 = vpack.c.bf16 %v1362_v34, %v1356_v40  ;;  %v1446_v21 = vld [vmem:[#allocation8 + $0x518] sm:$0xff]  ;;  %v2340_v22 = vpack.c.bf16 %v1433_v19, %v1427_v18  ;;  %v1292_v34 = vld [vmem:[#allocation8 + $0x48] sm:$0xff] }
 0x399   : > { %v2342_v23 = vpack.c.bf16 %v1446_v21, %v1440_v20  ;;  %v1458_v27 = vld [vmem:[#allocation8 + $0x578] sm:$0xff] }
 0x39a   : > { %2004 = vmatmul.mubr.msk.f32.gmra.mrb[6].mxu1 %vm1173_vm0, %v1152_v29  ;;  %v2346_v29 = vpack.c.bf16 %v1458_v27, %v1452_v26  ;;  %v1286_v40 = vld [vmem:[#allocation8 + $0x18] sm:$0xff]  ;;  %v1340_v27 = vld [vmem:[#allocation8 + $0x1c8] sm:$0xff] }
 0x39b   : > { %2305 = vmatpush1.bf16.msra.mxu1 %v2304_v28  ;;  %v2344_v28 = vpack.c.bf16 %v1445_v25, %v1439_v24  ;;  %v1327_v24 = vld [vmem:[#allocation8 + $0x160] sm:$0xff]  ;;  %v1334_v26 = vld [vmem:[#allocation8 + $0x198] sm:$0xff] }
 0x39c   : > { %2307 = vmatprep.subr.bf16.mxu1 %v2306_v30  ;;  %v1451_v30 = vld [vmem:[#allocation8 + $0x540] sm:$0xff] }
 0x39d   : > { %v2348_v32 = vpack.c.bf16 %v1457_v31, %v1451_v30  ;;  %v2370_v31 = vpack.c.bf16 %v1340_v27, %v1334_v26  ;;  %v1435_v26 = vld [vmem:[#allocation8 + $0x4c0] sm:$0xff]  ;;  %v1442_v27 = vld [vmem:[#allocation8 + $0x4f8] sm:$0xff] }
 0x39f   : > { %2309 = vmatpush1.bf16.msra.mxu1 %v2308_v36  ;;  %v2350_v36 = vpack.c.bf16 %v1470_v35, %v1464_v33  ;;  %v1339_v33 = vld [vmem:[#allocation8 + $0x1c0] sm:$0xff]  ;;  %v1346_v35 = vld [vmem:[#allocation8 + $0x1f8] sm:$0xff] }
 0x3a0   : > { %2311 = vmatprep.subr.bf16.mxu1 %v2310_v37  ;;  %v1463_v37 = vld [vmem:[#allocation8 + $0x5a0] sm:$0xff] }
 0x3a1   : > { %v2352_v39 = vpack.c.bf16 %v1469_v38, %v1463_v37 }
 0x3a3   : > { %2313 = vmatpush1.bf16.msra.mxu1 %v2312_v43  ;;  %v2354_v43 = vpack.c.bf16 %v1292_v34, %v1286_v40  ;;  %v1351_v40 = vld [vmem:[#allocation8 + $0x220] sm:$0xff]  ;;  %v1358_v34 = vld [vmem:[#allocation8 + $0x258] sm:$0xff] }
 0x3a4   : > { %2315 = vmatprep.subr.bf16.mxu1 %v2314_v45  ;;  %v1161_v45 = vld [vmem:[%s3418_s7] sm:$0x3] }
 0x3a5   : > { %v1166_v46 = vrot.slane %v1161_v45, %v3155_v42  ;;  %v1170_v47 = vrot.slane %v1161_v45, %v3161_v44 }
 0x3a7   : > { %2317 = vmatpush1.bf16.msra.mxu1 %v2316_v50 }
 0x3a8   : > { %2319 = vmatprep.subr.bf16.mxu1 %v2318_v51  ;;  %v1285_v51 = vld [vmem:[#allocation8 + $0x10] sm:$0xff] }
 0x3a9   : > { %v2356_v58 = vpack.c.bf16 %v1291_v52, %v1285_v51 }
 0x3ab   : > { %2321 = vmatpush1.bf16.msra.mxu1 %v2320_v56 }
 0x3ac   : > { %2323 = vmatprep.subr.bf16.mxu1 %v2322_v57 }
 0x3af   : > { %2325 = vmatpush1.bf16.msra.mxu1 %v2324_v62  ;;  %v2358_v62 = vpack.c.bf16 %v1304_v55, %v1298_v54  ;;  %v1375_v54 = vld [vmem:[#allocation8 + $0x2e0] sm:$0xff]  ;;  %v1382_v55 = vld [vmem:[#allocation8 + $0x318] sm:$0xff] }
 0x3b0   : > { %2327 = vmatprep.subr.bf16.mxu1 %v2326_v63  ;;  %v1297_v63 = vld [vmem:[#allocation8 + $0x70] sm:$0xff] }
 0x3b1   : > { %v2360_v6 = vpack.c.bf16 %v1303_v0, %v1297_v63  ;;  %v1394_v63 = vld [vmem:[#allocation8 + $0x378] sm:$0xff]  ;;  %v1400_v0 = vld [vmem:[#allocation8 + $0x3a8] sm:$0xff] }
 0x3b3   : > { %2329 = vmatpush1.bf16.msra.mxu1 %v2328_v4 }
 0x3b4   : > { %2331 = vmatprep.subr.bf16.mxu1 %v2330_v5 }
 0x3b7   : > { %2333 = vmatpush1.bf16.msra.mxu1 %v2332_v10  ;;  %v2362_v10 = vpack.c.bf16 %v1316_v3, %v1310_v2  ;;  %v2390_v2 = vpack.c.bf16 %v1400_v0, %v1394_v63  ;;  %v1393_v3 = vld [vmem:[#allocation8 + $0x370] sm:$0xff]  ;;  %v1312_v0 = vld [vmem:[#allocation8 + $0xe8] sm:$0xff] }
 0x3b8   : > { %2335 = vmatprep.subr.bf16.mxu1 %v2334_v11  ;;  %v1309_v11 = vld [vmem:[#allocation8 + $0xd0] sm:$0xff] }
 0x3b9   : > { %v2364_v18 = vpack.c.bf16 %v1315_v12, %v1309_v11  ;;  %v1405_v11 = vld [vmem:[#allocation8 + $0x3d0] sm:$0xff]  ;;  %v1411_v12 = vld [vmem:[#allocation8 + $0x400] sm:$0xff] }
 0x3ba   : > { %v1305_v63 = vld [vmem:[#allocation8 + $0xb0] sm:$0xff] }
 0x3bb   : > { %2337 = vmatpush1.bf16.msra.mxu1 %v2336_v16 }
 0x3bc   : > { %2339 = vmatprep.subr.bf16.mxu1 %v2338_v17 }
 0x3bf   : > { %2341 = vmatpush1.bf16.msra.mxu1 %v2340_v22  ;;  %v2366_v22 = vpack.c.bf16 %v1328_v15, %v1322_v14  ;;  %v1424_v14 = vld [vmem:[#allocation8 + $0x468] sm:$0xff]  ;;  %v2396_v15 = vpack.c.bf16 %v1411_v12, %v1405_v11  ;;  %v1323_v12 = vld [vmem:[#allocation8 + $0x140] sm:$0xff] }
 0x3c0   : > { %2343 = vmatprep.subr.bf16.mxu1 %v2342_v23  ;;  %v1321_v23 = vld [vmem:[#allocation8 + $0x130] sm:$0xff] }
 0x3c3   : > { %2345 = vmatpush1.bf16.msra.mxu1 %v2344_v28 }
 0x3c4   : > { %2347 = vmatprep.subr.bf16.mxu1 %v2346_v29  ;;  %v2368_v29 = vpack.c.bf16 %v1327_v24, %v1321_v23 }
 0x3c7   : > { %2349 = vmatpush1.bf16.msra.mxu1 %v2348_v32  ;;  %v1333_v32 = vld [vmem:[#allocation8 + $0x190] sm:$0xff] }
 0x3c8   : > { %2351 = vmatprep.subr.bf16.mxu1 %v2350_v36  ;;  %v1352_v36 = vld [vmem:[#allocation8 + $0x228] sm:$0xff]  ;;  %v2372_v37 = vpack.c.bf16 %v1339_v33, %v1333_v32  ;;  %v1441_v33 = vld [vmem:[#allocation8 + $0x4f0] sm:$0xff] }
 0x3c9   : > { %v2374_v38 = vpack.c.bf16 %v1352_v36, %v1346_v35  ;;  %v1447_v35 = vld [vmem:[#allocation8 + $0x520] sm:$0xff]  ;;  %v1454_v36 = vld [vmem:[#allocation8 + $0x558] sm:$0xff] }
 0x3cb   : > { %2353 = vmatpush1.bf16.msra.mxu1 %v2352_v39  ;;  %v1345_v39 = vld [vmem:[#allocation8 + $0x1f0] sm:$0xff] }
 0x3cc   : > { %2355 = vmatprep.subr.bf16.mxu1 %v2354_v43  ;;  %v1364_v43 = vld [vmem:[#allocation8 + $0x288] sm:$0xff]  ;;  %v2376_v45 = vpack.c.bf16 %v1351_v40, %v1345_v39  ;;  %v1453_v40 = vld [vmem:[#allocation8 + $0x550] sm:$0xff] }
 0x461   : > { %v1252_v48 = vpop.f32.mrb[0].mxu1 }
 0x462   : > { %v1253_v49 = vadd.f32 %v1252_v48, %v1166_v46  ;;  %v1254_v50 = vpop.f32.mrb[1].mxu1  ;;  %v1363_v48 = vld [vmem:[#allocation8 + $0x280] sm:$0xff] }
 0x463   : > { %v1255_v53 = vadd.f32 %v1254_v50, %v1170_v47  ;;  %v1376_v50 = vld [vmem:[#allocation8 + $0x2e8] sm:$0xff] }
 0x464   : > { %v3244_v59 = vmax.f32 %v1253_v49, 0.0  ;;  %v1370_v49 = vld [vmem:[#allocation8 + $0x2b8] sm:$0xff] }
 0x465   : > { %v3242_v56 = vmax.f32 %v1255_v53, 0.0  ;;  %v1258_v57 = vpop.f32.mrb[2].mxu1  ;;  %v2382_v52 = vpack.c.bf16 %v1376_v50, %v1370_v49  ;;  %v1369_v53 = vld [vmem:[#allocation8 + $0x2b0] sm:$0xff]  ;;  %v1471_v49 = vld [vmem:[#allocation8 + $0x5e0] sm:$0xff]  ;;  %v1288_v50 = vld [vmem:[#allocation8 + $0x28] sm:$0xff] }
 0x466   : > { %v1259_v60 = vadd.f32 %v1258_v57, %v1166_v46  ;;  %v1260_v61 = vpop.f32.mrb[3].mxu1  ;;  %v1388_v57 = vld [vmem:[#allocation8 + $0x348] sm:$0xff] }
 0x467   : > { %v1261_v1 = vadd.f32 %v1260_v61, %v1170_v47  ;;  %1571 = vmatprep.mubr.f32.mxu1 %v3242_v56  ;;  %v1381_v61 = vld [vmem:[#allocation8 + $0x310] sm:$0xff] }
 0x468   : > { %1572 = vmatmul.mubr.f32.vlgmr.msra.gmra.mrb[8].mxu1 %v3244_v59  ;;  %v3250_v7 = vmax.f32 %v1259_v60, 0.0  ;;  %v2386_v60 = vpack.c.bf16 %v1388_v57, %v1382_v55  ;;  %v1293_v55 = vld [vmem:[#allocation8 + $0x50] sm:$0xff]  ;;  %v1300_v57 = vld [vmem:[#allocation8 + $0x88] sm:$0xff] }
 0x469   : > { %v3248_v4 = vmax.f32 %v1261_v1, 0.0  ;;  %2357 = vmatpush1.bf16.msra.mxu1 %v2356_v58  ;;  %v1264_v5 = vpop.f32.mrb[4].mxu1  ;;  %v2384_v58 = vpack.c.bf16 %v1375_v54, %v1369_v53  ;;  %v1287_v54 = vld [vmem:[#allocation8 + $0x20] sm:$0xff] }
 0x46a   : > { %v1265_v8 = vadd.f32 %v1264_v5, %v1166_v46  ;;  %v1266_v9 = vpop.f32.mrb[5].mxu1  ;;  %2359 = vmatprep.subr.bf16.mxu1 %v2358_v62  ;;  %v1387_v62 = vld [vmem:[#allocation8 + $0x340] sm:$0xff] }
 0x46b   : > { %v1267_v13 = vadd.f32 %v1266_v9, %v1170_v47  ;;  %1577 = vmatprep.mubr.f32.mxu1 %v3248_v4  ;;  %v2388_v1 = vpack.c.bf16 %v1387_v62, %v1381_v61  ;;  %v1399_v5 = vld [vmem:[#allocation8 + $0x3a0] sm:$0xff] }
 0x46c   : > { %1578 = vmatmul.mubr.f32.gmra.mrb[10].mxu1 %v3250_v7  ;;  %v3256_v19 = vmax.f32 %v1265_v8, 0.0  ;;  %v1412_v8 = vld [vmem:[#allocation8 + $0x408] sm:$0xff]  ;;  %v2392_v9 = vpack.c.bf16 %v1399_v5, %v1393_v3  ;;  %v1299_v62 = vld [vmem:[#allocation8 + $0x80] sm:$0xff] }
 0x46d   : > { %v3254_v16 = vmax.f32 %v1267_v13, 0.0  ;;  %2361 = vmatpush1.bf16.msra.mxu1 %v2360_v6  ;;  %v1270_v17 = vpop.f32.mrb[6].mxu1  ;;  %v1406_v6 = vld [vmem:[#allocation8 + $0x3d8] sm:$0xff]  ;;  %v1311_v5 = vld [vmem:[#allocation8 + $0xe0] sm:$0xff] }
 0x46e   : > { %v1271_v20 = vadd.f32 %v1270_v17, %v1166_v46  ;;  %v1272_v21 = vpop.f32.mrb[7].mxu1  ;;  %2363 = vmatprep.subr.bf16.mxu1 %v2362_v10  ;;  %v2378_v46 = vpack.c.bf16 %v1364_v43, %v1358_v34  ;;  %v2394_v10 = vpack.c.bf16 %v1412_v8, %v1406_v6  ;;  %v1418_v13 = vld [vmem:[#allocation8 + $0x438] sm:$0xff]  ;;  %v1459_v34 = vld [vmem:[#allocation8 + $0x580] sm:$0xff]  ;;  %v1317_v6 = vld [vmem:[#allocation8 + $0x110] sm:$0xff] }
 0x46f   : > { %v1273_v25 = vadd.f32 %v1272_v21, %v1170_v47  ;;  %1583 = vmatprep.mubr.f32.mxu1 %v3254_v16  ;;  %v1357_v47 = vld [vmem:[#allocation8 + $0x250] sm:$0xff]  ;;  %v2398_v17 = vpack.c.bf16 %v1424_v14, %v1418_v13  ;;  %v1430_v21 = vld [vmem:[#allocation8 + $0x498] sm:$0xff]  ;;  %v1324_v8 = vld [vmem:[#allocation8 + $0x148] sm:$0xff] }
 0x470   : > { %1584 = vmatmul.mubr.f32.gmra.mrb[12].mxu1 %v3256_v19  ;;  %v3262_v30 = vmax.f32 %v1271_v20, 0.0  ;;  %v2380_v51 = vpack.c.bf16 %v1363_v48, %v1357_v47  ;;  %v1423_v20 = vld [vmem:[#allocation8 + $0x460] sm:$0xff]  ;;  %v1466_v43 = vld [vmem:[#allocation8 + $0x5b8] sm:$0xff]  ;;  %v1465_v48 = vld [vmem:[#allocation8 + $0x5b0] sm:$0xff] }
 0x471   : > { %v3260_v28 = vmax.f32 %v1273_v25, 0.0  ;;  %2365 = vmatpush1.bf16.msra.mxu1 %v2364_v18  ;;  %v1417_v18 = vld [vmem:[#allocation8 + $0x430] sm:$0xff]  ;;  %v1336_v14 = vld [vmem:[#allocation8 + $0x1a8] sm:$0xff] }
 0x472   : > { %2367 = vmatprep.subr.bf16.mxu1 %v2366_v22  ;;  %v1436_v22 = vld [vmem:[#allocation8 + $0x4c8] sm:$0xff]  ;;  %v2400_v23 = vpack.c.bf16 %v1423_v20, %v1417_v18  ;;  %v1429_v25 = vld [vmem:[#allocation8 + $0x490] sm:$0xff]  ;;  %v1335_v20 = vld [vmem:[#allocation8 + $0x1a0] sm:$0xff] }
 0x473   : > { %1589 = vmatprep.mubr.f32.mxu1 %v3260_v28  ;;  %v2402_v24 = vpack.c.bf16 %v1436_v22, %v1430_v21  ;;  %v1329_v13 = vld [vmem:[#allocation8 + $0x170] sm:$0xff]  ;;  %v1348_v22 = vld [vmem:[#allocation8 + $0x208] sm:$0xff] }
 0x474   : > { %1590 = vmatmul.mubr.f32.gmra.mrb[14].mxu1 %v3262_v30  ;;  %v1341_v21 = vld [vmem:[#allocation8 + $0x1d0] sm:$0xff] }
 0x475   : > { %2369 = vmatpush1.bf16.msra.mxu1 %v2368_v29  ;;  %1660 = vmatprep.mubr.f32.mxu1 %v3242_v56  ;;  %v1448_v29 = vld [vmem:[#allocation8 + $0x528] sm:$0xff] }
 0x476   : > { %2371 = vmatprep.subr.bf16.mxu1 %v2370_v31  ;;  %v2404_v31 = vpack.c.bf16 %v1435_v26, %v1429_v25  ;;  %v2406_v32 = vpack.c.bf16 %v1448_v29, %v1442_v27  ;;  %v1347_v26 = vld [vmem:[#allocation8 + $0x200] sm:$0xff]  ;;  %v1353_v27 = vld [vmem:[#allocation8 + $0x230] sm:$0xff]  ;;  %v1360_v29 = vld [vmem:[#allocation8 + $0x268] sm:$0xff] }
 0x479   : > { %2373 = vmatpush1.bf16.msra.mxu1 %v2372_v37  ;;  %v1460_v37 = vld [vmem:[#allocation8 + $0x588] sm:$0xff] }
 0x47a   : > { %2375 = vmatprep.subr.bf16.mxu1 %v2374_v38  ;;  %v2408_v38 = vpack.c.bf16 %v1447_v35, %v1441_v33  ;;  %v2410_v39 = vpack.c.bf16 %v1460_v37, %v1454_v36  ;;  %v1359_v35 = vld [vmem:[#allocation8 + $0x260] sm:$0xff]  ;;  %v1365_v36 = vld [vmem:[#allocation8 + $0x290] sm:$0xff]  ;;  %v1372_v37 = vld [vmem:[#allocation8 + $0x2c8] sm:$0xff] }
 0x47d   : > { %2377 = vmatpush1.bf16.msra.mxu1 %v2376_v45  ;;  %v1472_v45 = vld [vmem:[#allocation8 + $0x5e8] sm:$0xff] }
 0x47e   : > { %2379 = vmatprep.subr.bf16.mxu1 %v2378_v46  ;;  %v2412_v46 = vpack.c.bf16 %v1459_v34, %v1453_v40  ;;  %v2414_v47 = vpack.c.bf16 %v1472_v45, %v1466_v43  ;;  %v1377_v34 = vld [vmem:[#allocation8 + $0x2f0] sm:$0xff]  ;;  %v1384_v43 = vld [vmem:[#allocation8 + $0x328] sm:$0xff]  ;;  %v1390_v45 = vld [vmem:[#allocation8 + $0x358] sm:$0xff] }
 0x481   : > { %2381 = vmatpush1.bf16.msra.mxu1 %v2380_v51  ;;  %v1294_v51 = vld [vmem:[#allocation8 + $0x58] sm:$0xff] }
 0x482   : > { %2383 = vmatprep.subr.bf16.mxu1 %v2382_v52  ;;  %v2416_v52 = vpack.c.bf16 %v1471_v49, %v1465_v48  ;;  %v2418_v53 = vpack.c.bf16 %v1294_v51, %v1288_v50  ;;  %v1383_v48 = vld [vmem:[#allocation8 + $0x320] sm:$0xff]  ;;  %v1389_v49 = vld [vmem:[#allocation8 + $0x350] sm:$0xff]  ;;  %v1396_v50 = vld [vmem:[#allocation8 + $0x388] sm:$0xff] }
 0x483   : > { %v1402_v51 = vld [vmem:[#allocation8 + $0x3b8] sm:$0xff] }
 0x485   : > { %2385 = vmatpush1.bf16.msra.mxu1 %v2384_v58  ;;  %v1306_v58 = vld [vmem:[#allocation8 + $0xb8] sm:$0xff] }
 0x486   : > { %2387 = vmatprep.subr.bf16.mxu1 %v2386_v60  ;;  %v2420_v60 = vpack.c.bf16 %v1293_v55, %v1287_v54  ;;  %v2422_v61 = vpack.c.bf16 %v1306_v58, %v1300_v57  ;;  %v1395_v54 = vld [vmem:[#allocation8 + $0x380] sm:$0xff]  ;;  %v1401_v55 = vld [vmem:[#allocation8 + $0x3b0] sm:$0xff]  ;;  %v1408_v57 = vld [vmem:[#allocation8 + $0x3e8] sm:$0xff] }
 0x487   : > { %v1414_v58 = vld [vmem:[#allocation8 + $0x418] sm:$0xff] }
 0x489   : > { %2389 = vmatpush1.bf16.msra.mxu1 %v2388_v1  ;;  %v1318_v1 = vld [vmem:[#allocation8 + $0x118] sm:$0xff] }
 0x48a   : > { %2391 = vmatprep.subr.bf16.mxu1 %v2390_v2  ;;  %v2424_v2 = vpack.c.bf16 %v1305_v63, %v1299_v62  ;;  %v2426_v3 = vpack.c.bf16 %v1318_v1, %v1312_v0  ;;  %v1407_v62 = vld [vmem:[#allocation8 + $0x3e0] sm:$0xff]  ;;  %v1413_v63 = vld [vmem:[#allocation8 + $0x410] sm:$0xff]  ;;  %v1420_v0 = vld [vmem:[#allocation8 + $0x448] sm:$0xff] }
 0x48b   : > { %v1426_v1 = vld [vmem:[#allocation8 + $0x478] sm:$0xff] }
 0x48d   : > { %2393 = vmatpush1.bf16.msra.mxu1 %v2392_v9  ;;  %v1330_v9 = vld [vmem:[#allocation8 + $0x178] sm:$0xff] }
 0x48e   : > { %2395 = vmatprep.subr.bf16.mxu1 %v2394_v10  ;;  %v2428_v10 = vpack.c.bf16 %v1317_v6, %v1311_v5  ;;  %v2430_v11 = vpack.c.bf16 %v1330_v9, %v1324_v8  ;;  %v1419_v5 = vld [vmem:[#allocation8 + $0x440] sm:$0xff]  ;;  %v1425_v6 = vld [vmem:[#allocation8 + $0x470] sm:$0xff]  ;;  %v1432_v8 = vld [vmem:[#allocation8 + $0x4a8] sm:$0xff] }
 0x48f   : > { %v1438_v9 = vld [vmem:[#allocation8 + $0x4d8] sm:$0xff] }
 0x491   : > { %2397 = vmatpush1.bf16.msra.mxu1 %v2396_v15  ;;  %v1342_v15 = vld [vmem:[#allocation8 + $0x1d8] sm:$0xff] }
 0x492   : > { %2399 = vmatprep.subr.bf16.mxu1 %v2398_v17  ;;  %v2432_v17 = vpack.c.bf16 %v1329_v13, %v1323_v12  ;;  %v2434_v18 = vpack.c.bf16 %v1342_v15, %v1336_v14  ;;  %v1431_v12 = vld [vmem:[#allocation8 + $0x4a0] sm:$0xff]  ;;  %v1437_v13 = vld [vmem:[#allocation8 + $0x4d0] sm:$0xff]  ;;  %v1444_v14 = vld [vmem:[#allocation8 + $0x508] sm:$0xff] }
 0x493   : > { %v1450_v15 = vld [vmem:[#allocation8 + $0x538] sm:$0xff] }
 0x495   : > { %2401 = vmatpush1.bf16.msra.mxu1 %v2400_v23  ;;  %v1354_v23 = vld [vmem:[#allocation8 + $0x238] sm:$0xff] }
 0x496   : > { %2403 = vmatprep.subr.bf16.mxu1 %v2402_v24  ;;  %v2436_v24 = vpack.c.bf16 %v1341_v21, %v1335_v20  ;;  %v2438_v25 = vpack.c.bf16 %v1354_v23, %v1348_v22  ;;  %v1443_v20 = vld [vmem:[#allocation8 + $0x500] sm:$0xff]  ;;  %v1449_v21 = vld [vmem:[#allocation8 + $0x530] sm:$0xff]  ;;  %v1456_v22 = vld [vmem:[#allocation8 + $0x568] sm:$0xff] }
 0x497   : > { %v1462_v23 = vld [vmem:[#allocation8 + $0x598] sm:$0xff] }
 0x499   : > { %2405 = vmatpush1.bf16.msra.mxu1 %v2404_v31  ;;  %v1366_v31 = vld [vmem:[#allocation8 + $0x298] sm:$0xff] }
 0x49a   : > { %2407 = vmatprep.subr.bf16.mxu1 %v2406_v32  ;;  %v2440_v32 = vpack.c.bf16 %v1353_v27, %v1347_v26  ;;  %v2442_v33 = vpack.c.bf16 %v1366_v31, %v1360_v29  ;;  %v1455_v26 = vld [vmem:[#allocation8 + $0x560] sm:$0xff]  ;;  %v1461_v27 = vld [vmem:[#allocation8 + $0x590] sm:$0xff]  ;;  %v1468_v29 = vld [vmem:[#allocation8 + $0x5c8] sm:$0xff] }
 0x49b   : > { %v1474_v31 = vld [vmem:[#allocation8 + $0x5f8] sm:$0xff] }
 0x49d   : > { %2409 = vmatpush1.bf16.msra.mxu1 %v2408_v38  ;;  %v1378_v38 = vld [vmem:[#allocation8 + $0x2f8] sm:$0xff] }
 0x49e   : > { %2411 = vmatprep.subr.bf16.mxu1 %v2410_v39  ;;  %v2444_v39 = vpack.c.bf16 %v1365_v36, %v1359_v35  ;;  %v2446_v40 = vpack.c.bf16 %v1378_v38, %v1372_v37  ;;  %v1467_v35 = vld [vmem:[#allocation8 + $0x5c0] sm:$0xff]  ;;  %v1473_v36 = vld [vmem:[#allocation8 + $0x5f0] sm:$0xff] }
 0x49f   : > { %v2480_v37 = vpack.c.bf16 %v1473_v36, %v1467_v35  ;;  %v3285_v38 = vld [vmem:[%s3420_s9] sm:$0x3f] }
 0x4a1   : > { %2413 = vmatpush1.bf16.msra.mxu1 %v2412_v46 }
 0x4a2   : > { %2415 = vmatprep.subr.bf16.mxu1 %v2414_v47  ;;  %v2450_v47 = vpack.c.bf16 %v1390_v45, %v1384_v43 }
 0x4a5   : > { %2417 = vmatpush1.bf16.msra.mxu1 %v2416_v52  ;;  %v2452_v52 = vpack.c.bf16 %v1389_v49, %v1383_v48 }
 0x4a6   : > { %2419 = vmatprep.subr.bf16.mxu1 %v2418_v53  ;;  %v2454_v53 = vpack.c.bf16 %v1402_v51, %v1396_v50 }
 0x4a8   : > { %1661 = vmatmul.mubr.f32.vlgmr.msra.gmra.mrb[16].mxu1 %v3244_v59 }
 0x4a9   : > { %1666 = vmatprep.mubr.f32.mxu1 %v3248_v4  ;;  %2421 = vmatpush1.bf16.msra.mxu1 %v2420_v60  ;;  %v2456_v60 = vpack.c.bf16 %v1401_v55, %v1395_v54 }
 0x4aa   : > { %2423 = vmatprep.subr.bf16.mxu1 %v2422_v61  ;;  %v2458_v61 = vpack.c.bf16 %v1414_v58, %v1408_v57 }
 0x4ac   : > { %1667 = vmatmul.mubr.f32.gmra.mrb[18].mxu1 %v3250_v7 }
 0x4ad   : > { %1672 = vmatprep.mubr.f32.mxu1 %v3254_v16  ;;  %2425 = vmatpush1.bf16.msra.mxu1 %v2424_v2  ;;  %v2460_v2 = vpack.c.bf16 %v1413_v63, %v1407_v62 }
 0x4ae   : > { %2427 = vmatprep.subr.bf16.mxu1 %v2426_v3  ;;  %v2462_v3 = vpack.c.bf16 %v1426_v1, %v1420_v0 }
 0x4b0   : > { %1673 = vmatmul.mubr.f32.gmra.mrb[20].mxu1 %v3256_v19 }
 0x4b1   : > { %1678 = vmatprep.mubr.f32.mxu1 %v3260_v28  ;;  %2429 = vmatpush1.bf16.msra.mxu1 %v2428_v10  ;;  %v2464_v10 = vpack.c.bf16 %v1425_v6, %v1419_v5 }
 0x4b2   : > { %2431 = vmatprep.subr.bf16.mxu1 %v2430_v11  ;;  %v2466_v11 = vpack.c.bf16 %v1438_v9, %v1432_v8 }
 0x4b4   : > { %1679 = vmatmul.mubr.f32.gmra.mrb[22].mxu1 %v3262_v30 }
 0x4b5   : > { %2433 = vmatpush1.bf16.msra.mxu1 %v2432_v17  ;;  %1749 = vmatprep.mubr.f32.mxu1 %v3242_v56  ;;  %v1371_v56 = vld [vmem:[#allocation8 + $0x2c0] sm:$0xff]  ;;  %v2468_v17 = vpack.c.bf16 %v1437_v13, %v1431_v12 }
 0x4b6   : > { %2435 = vmatprep.subr.bf16.mxu1 %v2434_v18  ;;  %v2448_v46 = vpack.c.bf16 %v1377_v34, %v1371_v56  ;;  %v2470_v18 = vpack.c.bf16 %v1450_v15, %v1444_v14 }
 0x4b9   : > { %2437 = vmatpush1.bf16.msra.mxu1 %v2436_v24  ;;  %v2472_v24 = vpack.c.bf16 %v1449_v21, %v1443_v20 }
 0x4ba   : > { %2439 = vmatprep.subr.bf16.mxu1 %v2438_v25  ;;  %v2474_v25 = vpack.c.bf16 %v1462_v23, %v1456_v22 }
 0x4bd   : > { %2441 = vmatpush1.bf16.msra.mxu1 %v2440_v32  ;;  %v2476_v32 = vpack.c.bf16 %v1461_v27, %v1455_v26 }
 0x4be   : > { %2443 = vmatprep.subr.bf16.mxu1 %v2442_v33  ;;  %v2478_v33 = vpack.c.bf16 %v1474_v31, %v1468_v29 }
 0x4c1   : > { %2445 = vmatpush1.bf16.msra.mxu1 %v2444_v39 }
 0x4c2   : > { %2447 = vmatprep.subr.bf16.mxu1 %v2446_v40 }
 0x4c5   : > { %2449 = vmatpush1.bf16.msra.mxu1 %v2448_v46 }
 0x4c6   : > { %2451 = vmatprep.subr.bf16.mxu1 %v2450_v47 }
 0x4c9   : > { %2453 = vmatpush1.bf16.msra.mxu1 %v2452_v52 }
 0x4ca   : > { %2455 = vmatprep.subr.bf16.mxu1 %v2454_v53 }
 0x4cd   : > { %2457 = vmatpush1.bf16.msra.mxu1 %v2456_v60 }
 0x4ce   : > { %2459 = vmatprep.subr.bf16.mxu1 %v2458_v61 }
 0x4d1   : > { %2461 = vmatpush1.bf16.msra.mxu1 %v2460_v2 }
 0x4d2   : > { %2463 = vmatprep.subr.bf16.mxu1 %v2462_v3 }
 0x4d5   : > { %2465 = vmatpush1.bf16.msra.mxu1 %v2464_v10 }
 0x4d6   : > { %2467 = vmatprep.subr.bf16.mxu1 %v2466_v11 }
 0x4d9   : > { %2469 = vmatpush1.bf16.msra.mxu1 %v2468_v17 }
 0x4da   : > { %2471 = vmatprep.subr.bf16.mxu1 %v2470_v18 }
 0x4dd   : > { %2473 = vmatpush1.bf16.msra.mxu1 %v2472_v24 }
 0x4de   : > { %2475 = vmatprep.subr.bf16.mxu1 %v2474_v25 }
 0x4e1   : > { %2477 = vmatpush1.bf16.msra.mxu1 %v2476_v32 }
 0x4e2   : > { %2479 = vmatprep.subr.bf16.mxu1 %v2478_v33 }
 0x4e5   : > { %2481 = vmatpush1.bf16.msra.mxu1 %v2480_v37 }
 0x4e8   : > { %1750 = vmatmul.mubr.f32.vlgmr.msra.gmra.mrb[24].mxu1 %v3244_v59  ;;  %v1480_v59 = vrot.slane %v3285_v38, %v3155_v42 }
 0x4e9   : > { %1755 = vmatprep.mubr.f32.mxu1 %v3248_v4  ;;  %v1484_v4 = vrot.slane %v3285_v38, %v3161_v44 }
 0x4ec   : > { %1756 = vmatmul.mubr.f32.gmra.mrb[26].mxu1 %v3250_v7 }
 0x4ed   : > { %1761 = vmatprep.mubr.f32.mxu1 %v3254_v16 }
 0x4f0   : > { %1762 = vmatmul.mubr.f32.gmra.mrb[28].mxu1 %v3256_v19 }
 0x4f1   : > { %1767 = vmatprep.mubr.f32.mxu1 %v3260_v28 }
 0x4f4   : > { %1768 = vmatmul.mubr.f32.gmra.mrb[30].mxu1 %v3262_v30 }
 0x53b   : > { %v1573_v7 = vpop.f32.mrb[8].mxu1 }
 0x53c   : > { %v1574_v39 = vadd.f32 %v1573_v7, %v1480_v59  ;;  %v1575_v16 = vpop.f32.mrb[9].mxu1 }
 0x53d   : > { %v1576_v40 = vadd.f32 %v1575_v16, %v1484_v4 }
 0x53e   : > { %1774 = vst [vmem:[%s3293_s22] sm:$0xff] %v1574_v39 }
 0x53f   : > { %1775 = vst [vmem:[%s3293_s22 + $0x8] sm:$0xff] %v1576_v40  ;;  %v1579_v19 = vpop.f32.mrb[10].mxu1 }
 0x540   : > { %v1580_v42 = vadd.f32 %v1579_v19, %v1480_v59  ;;  %v1581_v44 = vpop.f32.mrb[11].mxu1 }
 0x541   : > { %v1582_v28 = vadd.f32 %v1581_v44, %v1484_v4 }
 0x542   : > { %1780 = vst [vmem:[%s3293_s22 + $0x30] sm:$0xff] %v1580_v42 }
 0x543   : > { %1781 = vst [vmem:[%s3293_s22 + $0x38] sm:$0xff] %v1582_v28  ;;  %v1585_v30 = vpop.f32.mrb[12].mxu1 }
 0x544   : > { %v1586_v56 = vadd.f32 %v1585_v30, %v1480_v59  ;;  %v1587_v34 = vpop.f32.mrb[13].mxu1 }
 0x545   : > { %v1588_v43 = vadd.f32 %v1587_v34, %v1484_v4 }
 0x546   : > { %1786 = vst [vmem:[%s3293_s22 + $0x60] sm:$0xff] %v1586_v56 }
 0x547   : > { %1787 = vst [vmem:[%s3293_s22 + $0x68] sm:$0xff] %v1588_v43  ;;  %v1591_v45 = vpop.f32.mrb[14].mxu1 }
 0x548   : > { %v1592_v46 = vadd.f32 %v1591_v45, %v1480_v59  ;;  %v1593_v47 = vpop.f32.mrb[15].mxu1 }
 0x549   : > { %v1594_v48 = vadd.f32 %v1593_v47, %v1484_v4 }
 0x54a   : > { %1792 = vst [vmem:[%s3293_s22 + $0x90] sm:$0xff] %v1592_v46 }
 0x54b   : > { %1793 = vst [vmem:[%s3293_s22 + $0x98] sm:$0xff] %v1594_v48 }
 0x54c   : > { %2739 = shalt.err (!%p2736_p9)
}
 0x54d   : > { %s2740_s16 = scalar_lea.hbm %s3310_s29, 512  ;;  %s2744_s2 = scalar_lea.hbm %s3454_s27, 1024 }
 0x54e   : > { %p2741_p0 = scmp.ne.s32.totalorder %s3310_s29, %s2740_s16  ;;  %p2745_p13 = scmp.lt.u32.totalorder %s3310_s29, %s3454_s27 }
 0x54f   : > { %p2746_p6 = scmp.lt.u32.totalorder %s2744_s2, %s2740_s16  ;;  %p2748_p3 = scmp.lt.u32.totalorder %s2740_s16, %s3310_s29 }
 0x550   : > { %p2742_p11 = pnand %p2741_p0, %p3057_p5 }
 0x551   : > { %p2747_p10 = por %p2746_p6, %p2745_p13 }
 0x552   : > { %p2743_p8 = pneg %p2742_p11 }
 0x553   : > { %p2749_p7 = por %p2748_p3, %p2747_p10 }
 0x555   : > { %p2750_p12 = pnand %p2749_p7, %p2743_p8 }
 0x557   : > { %2753 = shalt.err (!%p2750_p12)
}
 0x558   : > { %s2847_s25 = smov 128   ;;  %s2848_s30 = smov 8   ;;  %v1487_v49 = vsub.s32 2, %v3152_v41  ;;  %v1491_v50 = vsub.s32 3, %v3152_v41  ;;  %v1495_v9 = vsub.s32 4, %v3152_v41  ;;  %v1499_v10 = vsub.s32 5, %v3152_v41 }
 0x559   : > { %2525 = dma.vmem_to_hbm [thread:$0]  (%p3057_p5), %s3305_s12, 512, %s3310_s29, %s1808_s23, %s2847_s25, %s2847_s25, %s2848_s30  }
 0x55a   : > { %v1488_v51 = vrot.slane %v3285_v38, %v1487_v49  ;;  %v1492_v52 = vrot.slane %v3285_v38, %v1491_v50  ;;  %v1496_v11 = vrot.slane %v3285_v38, %v1495_v9  ;;  %v1500_v12 = vrot.slane %v3285_v38, %v1499_v10  ;;  %s2509_s12 = smul.u32 3072, %s2933_s21  ;;  %s1822_s29 = sshll.u32 %s3293_s22, 4  ;;  %s3365_s29 = int_to_ptr.vmem [resolvable:$true] %s1822_s29 }
 0x55b   : > { %s3455_s16 = sld [smem:[#allocation21_spill]]  ;;  %s1803_s21 = scalar_lea.sflag [#allocation4], %s3108_s26 }
 0x55c   : > { %s2754_s10 = scalar_lea.vmem %s3365_s29, 3072  ;;  %s2849_s2 = smov [#allocation10]  }
 0x55d   : > { %p2755_p2 = scmp.ne.s32.totalorder %s3365_s29, %s2754_s10  ;;  %s2758_s13 = sshll.u32 %s2849_s2, 4  ;;  %s2759_s13 = int_to_ptr.vmem [resolvable:$false] %s2758_s13 }
 0x55e   : > { %s2760_s24 = scalar_lea.vmem %s2759_s13, 6144  ;;  %p2761_p9 = scmp.lt.s32.totalorder %s3365_s29, %s2759_s13 }
 0x55f   : > { %p2756_p1 = pnand %p2755_p2, %p3057_p5  ;;  %p2762_p0 = scmp.lt.s32.totalorder %s2760_s24, %s2754_s10 }
 0x561   : > { %s3363_s14 = scalar_lea.hbm %s3455_s16, %s2509_s12  ;;  %p2757_p4 = pneg %p2756_p1 }
 0x562   : > { %p2763_p11 = por %p2762_p0, %p2761_p9 }
 0x564   : > { %p2764_p8 = pnand %p2763_p11, %p2757_p4 }
 0x57b   : > { %v1662_v53 = vpop.f32.mrb[16].mxu1 }
 0x57c   : > { %v1663_v54 = vadd.f32 %v1662_v53, %v1488_v51  ;;  %v1664_v55 = vpop.f32.mrb[17].mxu1 }
 0x57d   : > { %v1665_v57 = vadd.f32 %v1664_v55, %v1492_v52 }
 0x57e   : > { %1776 = vst [vmem:[%s3293_s22 + $0x10] sm:$0xff] %v1663_v54 }
 0x57f   : > { %1777 = vst [vmem:[%s3293_s22 + $0x18] sm:$0xff] %v1665_v57  ;;  %v1668_v58 = vpop.f32.mrb[18].mxu1 }
 0x580   : > { %v1669_v60 = vadd.f32 %v1668_v58, %v1488_v51  ;;  %v1670_v61 = vpop.f32.mrb[19].mxu1 }
 0x581   : > { %v1671_v62 = vadd.f32 %v1670_v61, %v1492_v52 }
 0x582   : > { %1782 = vst [vmem:[%s3293_s22 + $0x40] sm:$0xff] %v1669_v60 }
 0x583   : > { %1783 = vst [vmem:[%s3293_s22 + $0x48] sm:$0xff] %v1671_v62  ;;  %v1674_v63 = vpop.f32.mrb[20].mxu1 }
 0x584   : > { %v1675_v0 = vadd.f32 %v1674_v63, %v1488_v51  ;;  %v1676_v1 = vpop.f32.mrb[21].mxu1 }
 0x585   : > { %v1677_v2 = vadd.f32 %v1676_v1, %v1492_v52 }
 0x586   : > { %1788 = vst [vmem:[%s3293_s22 + $0x70] sm:$0xff] %v1675_v0 }
 0x587   : > { %1789 = vst [vmem:[%s3293_s22 + $0x78] sm:$0xff] %v1677_v2  ;;  %v1680_v3 = vpop.f32.mrb[22].mxu1 }
 0x588   : > { %v1681_v5 = vadd.f32 %v1680_v3, %v1488_v51  ;;  %v1682_v6 = vpop.f32.mrb[23].mxu1 }
 0x589   : > { %v1683_v8 = vadd.f32 %v1682_v6, %v1492_v52 }
 0x58a   : > { %1794 = vst [vmem:[%s3293_s22 + $0xa0] sm:$0xff] %v1681_v5 }
 0x58b   : > { %1795 = vst [vmem:[%s3293_s22 + $0xa8] sm:$0xff] %v1683_v8 }
 0x5bb   : > { %v1751_v13 = vpop.f32.mrb[24].mxu1 }
 0x5bc   : > { %v1752_v14 = vadd.f32 %v1751_v13, %v1496_v11  ;;  %v1753_v15 = vpop.f32.mrb[25].mxu1 }
 0x5bd   : > { %v1754_v17 = vadd.f32 %v1753_v15, %v1500_v12 }
 0x5be   : > { %1778 = vst [vmem:[%s3293_s22 + $0x20] sm:$0xff] %v1752_v14 }
 0x5bf   : > { %1779 = vst [vmem:[%s3293_s22 + $0x28] sm:$0xff] %v1754_v17  ;;  %v1757_v18 = vpop.f32.mrb[26].mxu1 }
 0x5c0   : > { %v1758_v20 = vadd.f32 %v1757_v18, %v1496_v11  ;;  %v1759_v21 = vpop.f32.mrb[27].mxu1 }
 0x5c1   : > { %v1760_v22 = vadd.f32 %v1759_v21, %v1500_v12 }
 0x5c2   : > { %1784 = vst [vmem:[%s3293_s22 + $0x50] sm:$0xff] %v1758_v20 }
 0x5c3   : > { %1785 = vst [vmem:[%s3293_s22 + $0x58] sm:$0xff] %v1760_v22  ;;  %v1763_v41 = vpop.f32.mrb[28].mxu1 }
 0x5c4   : > { %v1764_v23 = vadd.f32 %v1763_v41, %v1496_v11  ;;  %v1765_v24 = vpop.f32.mrb[29].mxu1 }
 0x5c5   : > { %v1766_v25 = vadd.f32 %v1765_v24, %v1500_v12 }
 0x5c6   : > { %1790 = vst [vmem:[%s3293_s22 + $0x80] sm:$0xff] %v1764_v23 }
 0x5c7   : > { %1791 = vst [vmem:[%s3293_s22 + $0x88] sm:$0xff] %v1766_v25  ;;  %v1769_v26 = vpop.f32.mrb[30].mxu1 }
 0x5c8   : > { %v1770_v27 = vadd.f32 %v1769_v26, %v1496_v11  ;;  %v1771_v29 = vpop.f32.mrb[31].mxu1 }
 0x5c9   : > { %v1772_v31 = vadd.f32 %v1771_v29, %v1500_v12 }
 0x5ca   : > { %1796 = vst [vmem:[%s3293_s22 + $0xb0] sm:$0xff] %v1770_v27 }
 0x5cb   : > { %1797 = vst [vmem:[%s3293_s22 + $0xb8] sm:$0xff] %v1772_v31 }
 0x5cc   : > { %2767 = shalt.err (!%p2764_p8)
}
 0x5cd   : > { %s2768_s22 = scalar_lea.hbm %s3363_s14, 3072  ;;  %s2772_s12 = scalar_lea.hbm %s3455_s16, 6144 }
 0x5ce   : > { %p2769_p13 = scmp.ne.s32.totalorder %s3363_s14, %s2768_s22  ;;  %p2773_p3 = scmp.lt.u32.totalorder %s3363_s14, %s3455_s16 }
 0x5cf   : > { %p2774_p7 = scmp.lt.u32.totalorder %s2772_s12, %s2768_s22  ;;  %p2776_p2 = scmp.lt.u32.totalorder %s2768_s22, %s3363_s14 }
 0x5d0   : > { %p2770_p6 = pnand %p2769_p13, %p3057_p5 }
 0x5d1   : > { %p2775_p12 = por %p2774_p7, %p2773_p3 }
 0x5d2   : > { %p2771_p10 = pneg %p2770_p6 }
 0x5d3   : > { %p2777_p1 = por %p2776_p2, %p2775_p12 }
 0x5d5   : > { %p2778_p4 = pnand %p2777_p1, %p2771_p10 }
 0x5d7   : > { %2781 = shalt.err (!%p2778_p4)
}
 0x5d8   : > { %s2850_s10 = smov 768   ;;  %s2851_s2 = smov 48  }
 0x5d9   : > { %2524 = dma.vmem_to_hbm [thread:$0]  (%p3057_p5), %s3365_s29, 3072, %s3363_s14, %s1803_s21, %s2850_s10, %s2850_s10, %s2851_s2  }
 0x5da PF: > { %s3456_s13 = sld [smem:[#allocation18_spill]]  ;;  %s3457_s24 = sld [smem:[#allocation19_spill]] }
 0x5db   : > { %p3459_p0 = scmp.ge.s32.totalorder %s2832_s20, 2 }
 0x5e0   : > { %s1853_s25 = sand.u32 1, %s3456_s13   ;;  %p3458_p9 = scmp.ne.s32.totalorder %s3457_s24, 0 }
 0x5e1   : > { %s1854_s22 = scalar_lea.sflag [#allocation4], %s1853_s25 }
 0x5e2   : > { %p2543_p11 = pnand %p3459_p0, %p3458_p9 }
 0x5e4   : > { %2811 = dma.done.wait (!%p2543_p11), %s1854_s22, 3072  }
 0x5e5   : > { %2813 = vsyncadd (!%p2543_p11), %s1854_s22, 4294964224  ;;  %s1863_s30 = scalar_lea.sflag [#allocation12], %s1853_s25 }
 0x5e6   : > { %2815 = dma.done.wait (!%p2543_p11), %s1863_s30, 512  }
 0x5e7   : > { %2817 = vsyncadd (!%p2543_p11), %s1863_s30, 4294966784  ;;  %s3460_s28 = smov %s3043_s17  ;;  %p30_p5 = scmp.ge.s32.totalorder %s3043_s17, 4  }
 0x5e8   : > { %s3461_s17 = smov %s2824_s18  ;;  %s3462_s18 = smov %s2828_s19 }
 0x5e9   : > { %s3463_s19 = smov %s3053_s15  ;;  %s3464_s20 = smov %s3460_s28 }
 0x5ea   :  { %32 = sbr.rel (!%p30_p5) target bundleno = 13 (0xd), region = 137 }
 0x5f1   :  { %1868 = vsyncpa [#allocation3], 1 }
 0x5f2   :  { %1870 = vsyncpa [#allocation3 + $0x1], 1 }
 0x5f3   :  { %1871 = vsyncpa [#allocation6], 1 }
 0x5f4   :  { %1872 = vsyncpa [#allocation9], 1 }
 0x5f5   :  { %1873 = vsyncpa [#allocation4], 1 }
 0x5f6   :  { %1875 = vsyncpa [#allocation4 + $0x1], 1 }
 0x5f7   :  { %1876 = vsyncpa [#allocation12], 1 }
 0x5f8   :  { %1878 = vsyncpa [#allocation12 + $0x1], 1 }

</bundles_post_ra>
